<compile_context>
chip_gen: v7x
topology: tpu7x:2x2x1
jax: 0.10.0
libtpu: 0.0.40
codegen_flags: <defaults>
</compile_context>

<pallas_src>
import functools

import jax
import jax.numpy as jnp
from jax import lax
from jax.experimental import pallas as pl
from jax.experimental.pallas import tpu as pltpu

_LANES = 128


def _round_up(x, m):
    return (x + m - 1) // m * m


def _modconv_kernel(x_hbm, w_ref, s_ref, d_ref, o_ref, xbuf, sem, *,
                    demodulate, K, tile_h, n_h):
    # x_hbm : (B, H+2p, Wp, Cin_p)  padded NHWC activations in HBM (manual DMA)
    # w_ref : (K, K, Cin_p, TCo)    shared un-modulated weights (MXU dtype)
    # s_ref : (1, 1, Cin_p) f32     style of this batch element
    # d_ref : (1, 1, TCo)   f32     demodulation scale of this (batch, co-block)
    # o_ref : (1, tile_h, W, TCo)   output tile
    # xbuf  : (2, THp, Wp, Cin_p)   manual double buffer for the halo band
    # sem   : DMA semaphores (2,)
    b = pl.program_id(0)
    h = pl.program_id(2)
    Cin_p = w_ref.shape[2]
    TCo = w_ref.shape[3]
    TH = tile_h
    W = o_ref.shape[2]
    THp = xbuf.shape[1]
    cdt = xbuf.dtype

    # ---- manual double-buffered halo-band DMA (overlapping bands, no HBM dup)
    def band_copy(hh, slot):
        return pltpu.make_async_copy(
            x_hbm.at[b, pl.ds(hh * TH, THp)], xbuf.at[slot], sem.at[slot])

    slot = h & 1

    @pl.when(h == 0)
    def _():
        band_copy(0, 0).start()              # prime first band of this (b, co)

    band_copy(h, slot).wait()

    @pl.when(h + 1 < n_h)
    def _():
        band_copy(h + 1, 1 - slot).start()   # prefetch next band (overlapped)

    # ---- fused modulation: scale activations by per-input-channel style -----
    s = s_ref[...].astype(jnp.float32)                        # (1,1,Cin_p)
    xs = (xbuf[slot].astype(jnp.float32) * s).astype(cdt)     # (THp,Wp,Cin_p)

    # ---- conv: K*K shifted MXU matmuls, f32 accumulation in a traced value --
    # TODO(synk): the kw slice+reshape still materializes a small VMEM copy per
    # tap; an XLU-roll full-band matmul would take it off the vld/vst path.
    acc = None
    for kh in range(K):
        band = xs[kh:kh + TH, :, :]                           # (TH, Wp, Cin_p)
        for kw in range(K):
            patch = band[:, kw:kw + W, :].reshape(TH * W, Cin_p)
            c = jnp.dot(patch, w_ref[kh, kw],
                        preferred_element_type=jnp.float32)
            acc = c if acc is None else acc + c

    if demodulate:                                            # per-(b,co) scale
        acc = acc * d_ref[...].astype(jnp.float32).reshape(1, TCo)

    o_ref[...] = acc.reshape(1, TH, W, TCo).astype(o_ref.dtype)


def _vmem_budget_and_limit(vmem_budget_bytes):
    """Derive the tiling budget / scoped-VMEM limit from the real capacity."""
    try:
        cap = int(pltpu.get_tpu_info().vmem_capacity_bytes)
    except Exception:
        cap = 64 * 2 ** 20                    # conservative fallback (v7x-size)
    budget = (int(cap * 0.70) if vmem_budget_bytes is None
              else int(vmem_budget_bytes))
    budget = min(budget, int(cap * 0.85))
    limit = min(cap, budget + (12 << 20))
    return budget, limit


def _pick_tile_h(H, W, Wp, Cin_p, TCo, K, pad, cdt_isz, out_isz, budget):
    """Largest H-tile dividing H whose VMEM footprint fits the budget."""
    w_bytes = K * K * Cin_p * TCo * cdt_isz            # single-buffered weights

    def need(th):
        thp = th + 2 * pad
        xbuf = 2 * thp * Wp * Cin_p * cdt_isz          # manual double buffer
        xs = thp * Wp * Cin_p * (4 + cdt_isz)          # style-scaled copy
        o_blk = 2 * th * W * TCo * out_isz             # auto double-buffered out
        acc = th * W * TCo * 4                         # f32 accumulator
        return xbuf + xs + o_blk + acc + w_bytes

    best = 1
    for th in range(1, H + 1):
        if H % th == 0 and need(th) <= budget:
            best = th
    return best


def conv2d_weight_modulate(feature_map_nchw, style, weight_oikk, *,
                           demodulate=True, eps=1e-8, tile_h=None,
                           cout_block=None, mxu_dtype=jnp.bfloat16,
                           vmem_budget_bytes=None):
    """StyleGAN2 modulated conv.

    feature_map_nchw: (B, Cin, H, W); style: (B, Cin); weight: (Cout, Cin, K, K).
    Returns (B, Cout, H, W)."""
    B, Cin, H, W = feature_map_nchw.shape
    Cout, Cin_w, K, K2 = weight_oikk.shape
    assert Cin_w == Cin and K == K2
    if K % 2 == 0:
        # TODO(synk): even kernel sizes need asymmetric 'same' padding.
        raise ValueError("Only odd kernel_size is supported ('same' padding).")
    pad = K // 2

    out_dtype = feature_map_nchw.dtype
    cdt = jnp.dtype(mxu_dtype) if mxu_dtype is not None else jnp.dtype(out_dtype)

    Cin_p = _round_up(Cin, _LANES)
    Cout_p = _round_up(Cout, _LANES)
    Wp = W + 2 * pad

    if cout_block is None:
        cout_block = Cout_p                   # one block; set 128/256 for B==1 on v7x
    if cout_block % _LANES != 0 or Cout_p % cout_block != 0:
        raise ValueError(f"cout_block={cout_block} must be a multiple of 128 "
                         f"dividing {Cout_p}")
    TCo = cout_block
    NCo = Cout_p // TCo

    budget, vmem_limit = _vmem_budget_and_limit(vmem_budget_bytes)
    if tile_h is None:
        tile_h = _pick_tile_h(H, W, Wp, Cin_p, TCo, K, pad,
                              cdt.itemsize, jnp.dtype(out_dtype).itemsize,
                              budget)
    if H % tile_h != 0:
        raise ValueError(f"tile_h={tile_h} must divide H={H}")
    NH = H // tile_h
    THp = tile_h + 2 * pad

    # ---- XLA glue (layout only): NCHW -> 128-padded NHWC, zero 'same' pad,
    # cast to MXU dtype. A single padded copy: halo bands are NOT duplicated;
    # the kernel DMAs overlapping bands straight out of it.
    # TODO(synk): keep activations NHWC/128-padded across the whole network to
    # drop the per-layer transposes entirely.
    x_nhwc = jnp.transpose(feature_map_nchw, (0, 2, 3, 1))
    x_pad = jnp.pad(
        x_nhwc, ((0, 0), (pad, pad), (pad, pad), (0, Cin_p - Cin))).astype(cdt)

    # Shared, batch-invariant weights at the MXU dtype (accounting matches VMEM).
    w_kkio = jnp.transpose(weight_oikk, (2, 3, 1, 0))
    w_p = jnp.pad(
        w_kkio, ((0, 0), (0, 0), (0, Cin_p - Cin), (0, Cout_p - Cout))).astype(cdt)

    # Styles (f32) and demodulation scales: rsqrt(s^2 @ sum_kk(w^2) + eps),
    # a tiny (B,Cin)x(Cin,Cout) matmul — exactly the reference sigma_inv.
    s_f32 = style.astype(jnp.float32)
    s_p = jnp.pad(s_f32, ((0, 0), (0, Cin_p - Cin))).reshape(B, 1, Cin_p)
    if demodulate:
        w_f32 = weight_oikk.astype(jnp.float32)
        wsq = jnp.sum(w_f32 * w_f32, axis=(2, 3))            # (Cout, Cin)
        sigma2 = (s_f32 * s_f32) @ wsq.T                     # (B, Cout)
        dscale = lax.rsqrt(sigma2 + jnp.float32(eps))
    else:
        dscale = jnp.ones((B, Cout), jnp.float32)
    d_p = jnp.pad(dscale, ((0, 0), (0, Cout_p - Cout))).reshape(B, 1, Cout_p)

    kernel = functools.partial(_modconv_kernel, demodulate=demodulate, K=K,
                               tile_h=tile_h, n_h=NH)

    cost = pl.CostEstimate(
        flops=2 * B * H * W * K * K * Cin * Cout,
        transcendentals=0,
        bytes_accessed=(x_pad.size * x_pad.dtype.itemsize
                        + w_p.size * w_p.dtype.itemsize
                        + s_p.size * 4 + d_p.size * 4
                        + B * H * W * Cout_p * jnp.dtype(out_dtype).itemsize))

    out_nhwc_p = pl.pallas_call(
        kernel,
        out_shape=jax.ShapeDtypeStruct((B, H, W, Cout_p), out_dtype),
        grid_spec=pltpu.PrefetchScalarGridSpec(
            num_scalar_prefetch=0,
            grid=(B, NCo, NH),
            in_specs=[
                pl.BlockSpec(memory_space=pl.ANY),           # x: HBM, manual DMA
                pl.BlockSpec((K, K, Cin_p, TCo),
                             lambda b, co, h: (0, 0, 0, co),
                             pipeline_mode=pl.Buffered(1)),  # grid-invariant
                pl.BlockSpec((1, 1, Cin_p),
                             lambda b, co, h: (b, 0, 0),
                             pipeline_mode=pl.Buffered(1)),
                pl.BlockSpec((1, 1, TCo),
                             lambda b, co, h: (b, 0, co),
                             pipeline_mode=pl.Buffered(1)),
            ],
            out_specs=pl.BlockSpec((1, tile_h, W, TCo),
                                   lambda b, co, h: (b, h, 0, co)),
            scratch_shapes=[
                pltpu.VMEM((2, THp, Wp, Cin_p), cdt),        # halo-band buffers
                pltpu.SemaphoreType.DMA((2,)),
            ],
        ),
        compiler_params=pltpu.CompilerParams(
            dimension_semantics=("parallel", "parallel", "arbitrary"),
            vmem_limit_bytes=vmem_limit),
        cost_estimate=cost,
    )(x_pad, w_p, s_p, d_p)

    out = out_nhwc_p if Cout_p == Cout else out_nhwc_p[..., :Cout]
    return jnp.transpose(out, (0, 3, 1, 2))                  # back to NCHW


def _reference(feature_map_nchw, style, weight_oikk, demodulate=True, eps=1e-8):
    """Pure-JAX reference mirroring the PyTorch module (for validation)."""
    w = weight_oikk[None] * style[:, None, :, None, None]
    if demodulate:
        w = w * lax.rsqrt(jnp.sum(w ** 2, axis=(2, 3, 4), keepdims=True) + eps)

    def conv_one(x, wb):  # x: (Cin,H,W), wb: (Cout,Cin,K,K)
        return lax.conv_general_dilated(
            x[None], wb, window_strides=(1, 1), padding="SAME",
            dimension_numbers=("NCHW", "OIHW", "NCHW"))[0]

    return jax.vmap(conv_one)(feature_map_nchw, w)


if __name__ == "__main__":
    B, Cin, Cout, H, W, K = 2, 4, 8, 16, 16, 3
    demodulate, eps = True, 1e-8

    key = jax.random.PRNGKey(0)
    k_x, k_s, k_w = jax.random.split(key, 3)

    x = jax.random.normal(k_x, (B, Cin, H, W), dtype=jnp.float32)
    style = jax.random.normal(k_s, (B, Cin), dtype=jnp.float32)

    # EqualizedWeight([Cout, Cin, K, K]): param ~ N(0,1), scaled by 1/sqrt(fan_in)
    weight_param = jax.random.normal(k_w, (Cout, Cin, K, K), dtype=jnp.float32)
    weight = weight_param * (1.0 / jnp.sqrt(jnp.float32(Cin * K * K)))

    ref = _reference(x, style, weight, demodulate=demodulate, eps=eps)

    # Exact f32-MXU path; tile_h=8 -> 2 H tiles per batch element so the manual
    # double-buffered halo-band DMA path (prime + prefetch) is exercised.
    out_f32 = conv2d_weight_modulate(x, style, weight, demodulate=demodulate,
                                     eps=eps, tile_h=8, mxu_dtype=jnp.float32)
    out_f32 = jax.block_until_ready(out_f32)
    assert out_f32.shape == (B, Cout, H, W), out_f32.shape
    err = float(jnp.max(jnp.abs(out_f32 - ref)))
    assert jnp.allclose(out_f32, ref, atol=1e-4, rtol=1e-4), err

    # Default path: bf16 MXU operands (f32 modulate/demodulate, f32 accumulate),
    # auto tile_h from the VMEM budget (single tile here -> prime-only DMA path).
    out_bf16 = conv2d_weight_modulate(x, style, weight, demodulate=demodulate,
                                      eps=eps)
    out_bf16 = jax.block_until_ready(out_bf16)
    err_bf16 = float(jnp.max(jnp.abs(out_bf16 - ref)))
    assert jnp.allclose(out_bf16, ref, atol=5e-2, rtol=5e-2), err_bf16

    # demodulate=False branch (f32, exact).
    ref_nd = _reference(x, style, weight, demodulate=False, eps=eps)
    out_nd = conv2d_weight_modulate(x, style, weight, demodulate=False,
                                    eps=eps, tile_h=8, mxu_dtype=jnp.float32)
    out_nd = jax.block_until_ready(out_nd)
    err_nd = float(jnp.max(jnp.abs(out_nd - ref_nd)))
    assert jnp.allclose(out_nd, ref_nd, atol=1e-4, rtol=1e-4), err_nd

    print("KERNEL_OK")
</pallas_src>

<mosaic_0001>
module attributes {stable_mosaic.version = 11 : i64} {
  func.func @_modconv_kernel(%arg0: i32, %arg1: i32, %arg2: i32, %arg3: memref<2x18x18x128xf32, #tpu.memory_space<any>>, %arg4: memref<3x3x128x128xf32, #tpu.memory_space<vmem>>, %arg5: memref<1x1x128xf32, #tpu.memory_space<vmem>>, %arg6: memref<1x1x128xf32, #tpu.memory_space<vmem>>, %arg7: memref<1x8x16x128xf32, #tpu.memory_space<vmem>>, %arg8: memref<2x10x18x128xf32, #tpu.memory_space<vmem>>, %arg9: memref<2x!tpu.dma_semaphore, #tpu.memory_space<semaphore_mem>>) attributes {dimension_semantics = [#tpu.dimension_semantics<parallel>, #tpu.dimension_semantics<parallel>, #tpu.dimension_semantics<arbitrary>], iteration_bounds = array<i64: 2, 1, 2>, scalar_prefetch = 0 : i64, scratch_operands = 2 : i64, tpu.core_type = #tpu.core_type<tc>, window_params = [{}, {pipeline_mode = #tpu.pipeline_mode<synchronous>, transform_indices = @transform_1, window_bounds = array<i64: 3, 3, 128, 128>}, {pipeline_mode = #tpu.pipeline_mode<synchronous>, transform_indices = @transform_2, window_bounds = array<i64: 1, 1, 128>}, {pipeline_mode = #tpu.pipeline_mode<synchronous>, transform_indices = @transform_3, window_bounds = array<i64: 1, 1, 128>}, {transform_indices = @transform_4, window_bounds = array<i64: 1, 8, 16, 128>}]} {
    %c1_i32 = arith.constant 1 : i32
    %0 = arith.andi %arg2, %c1_i32 : i32
    %c0_i32 = arith.constant 0 : i32
    %1 = arith.cmpi eq, %arg2, %c0_i32 : i32
    %2 = arith.extui %1 : i1 to i32
    %c0_i32_0 = arith.constant 0 : i32
    %3 = arith.cmpi ne, %2, %c0_i32_0 : i32
    scf.if %3 {
      %c0_i32_62 = arith.constant 0 : i32
      %c0_i32_63 = arith.constant 0 : i32
      %c0_i32_64 = arith.constant 0 : i32
      %c0_i32_65 = arith.constant 0 : i32
      %c0_i32_66 = arith.constant 0 : i32
      %83 = tpu.memref_slice %arg3[%arg0, %c0_i32_64, %c0_i32_65, %c0_i32_66] : memref<2x18x18x128xf32, #tpu.memory_space<any>> -> memref<1x10x18x128xf32, #tpu.memory_space<any>>
      %84 = tpu.memref_squeeze %83 : memref<1x10x18x128xf32, #tpu.memory_space<any>> -> memref<10x18x128xf32, #tpu.memory_space<any>>
      %c0_i32_67 = arith.constant 0 : i32
      %c0_i32_68 = arith.constant 0 : i32
      %c0_i32_69 = arith.constant 0 : i32
      %85 = tpu.memref_slice %arg8[%c0_i32_62, %c0_i32_67, %c0_i32_68, %c0_i32_69] : memref<2x10x18x128xf32, #tpu.memory_space<vmem>> -> memref<1x10x18x128xf32, #tpu.memory_space<vmem>>
      %86 = tpu.memref_squeeze %85 : memref<1x10x18x128xf32, #tpu.memory_space<vmem>> -> memref<10x18x128xf32, #tpu.memory_space<vmem>>
      %87 = tpu.memref_slice %arg9[%c0_i32_63] : memref<2x!tpu.dma_semaphore, #tpu.memory_space<semaphore_mem>> -> memref<1x!tpu.dma_semaphore, #tpu.memory_space<semaphore_mem>>
      %88 = tpu.memref_squeeze %87 : memref<1x!tpu.dma_semaphore, #tpu.memory_space<semaphore_mem>> -> memref<!tpu.dma_semaphore, #tpu.memory_space<semaphore_mem>>
      tpu.enqueue_dma source(%84 : memref<10x18x128xf32, #tpu.memory_space<any>>) target(%86 : memref<10x18x128xf32, #tpu.memory_space<vmem>>) target_semaphore(%88 : memref<!tpu.dma_semaphore, #tpu.memory_space<semaphore_mem>>)
    } else {
    }
    %c8_i32 = arith.constant 8 : i32
    %4 = arith.muli %arg2, %c8_i32 : i32
    %c0_i32_1 = arith.constant 0 : i32
    %c0_i32_2 = arith.constant 0 : i32
    %5 = tpu.memref_slice %arg3[%arg0, %4, %c0_i32_1, %c0_i32_2] : memref<2x18x18x128xf32, #tpu.memory_space<any>> -> memref<1x10x18x128xf32, #tpu.memory_space<any>>
    %6 = tpu.memref_squeeze %5 : memref<1x10x18x128xf32, #tpu.memory_space<any>> -> memref<10x18x128xf32, #tpu.memory_space<any>>
    %c0_i32_3 = arith.constant 0 : i32
    %c0_i32_4 = arith.constant 0 : i32
    %c0_i32_5 = arith.constant 0 : i32
    %7 = tpu.memref_slice %arg8[%0, %c0_i32_3, %c0_i32_4, %c0_i32_5] : memref<2x10x18x128xf32, #tpu.memory_space<vmem>> -> memref<1x10x18x128xf32, #tpu.memory_space<vmem>>
    %8 = tpu.memref_squeeze %7 : memref<1x10x18x128xf32, #tpu.memory_space<vmem>> -> memref<10x18x128xf32, #tpu.memory_space<vmem>>
    %9 = tpu.memref_slice %arg9[%0] : memref<2x!tpu.dma_semaphore, #tpu.memory_space<semaphore_mem>> -> memref<1x!tpu.dma_semaphore, #tpu.memory_space<semaphore_mem>>
    %10 = tpu.memref_squeeze %9 : memref<1x!tpu.dma_semaphore, #tpu.memory_space<semaphore_mem>> -> memref<!tpu.dma_semaphore, #tpu.memory_space<semaphore_mem>>
    tpu.wait_dma2 semaphore(%10 : memref<!tpu.dma_semaphore, #tpu.memory_space<semaphore_mem>>) src(%6 : memref<10x18x128xf32, #tpu.memory_space<any>>) dst(%8 : memref<10x18x128xf32, #tpu.memory_space<vmem>>)
    %c1_i32_6 = arith.constant 1 : i32
    %11 = arith.addi %arg2, %c1_i32_6 : i32
    %c2_i32 = arith.constant 2 : i32
    %12 = arith.cmpi slt, %11, %c2_i32 : i32
    %13 = arith.extui %12 : i1 to i32
    %c0_i32_7 = arith.constant 0 : i32
    %14 = arith.cmpi ne, %13, %c0_i32_7 : i32
    scf.if %14 {
      %c1_i32_62 = arith.constant 1 : i32
      %83 = arith.addi %arg2, %c1_i32_62 : i32
      %c1_i32_63 = arith.constant 1 : i32
      %84 = arith.subi %c1_i32_63, %0 : i32
      %c8_i32_64 = arith.constant 8 : i32
      %85 = arith.muli %83, %c8_i32_64 : i32
      %c0_i32_65 = arith.constant 0 : i32
      %c0_i32_66 = arith.constant 0 : i32
      %86 = tpu.memref_slice %arg3[%arg0, %85, %c0_i32_65, %c0_i32_66] : memref<2x18x18x128xf32, #tpu.memory_space<any>> -> memref<1x10x18x128xf32, #tpu.memory_space<any>>
      %87 = tpu.memref_squeeze %86 : memref<1x10x18x128xf32, #tpu.memory_space<any>> -> memref<10x18x128xf32, #tpu.memory_space<any>>
      %c0_i32_67 = arith.constant 0 : i32
      %c0_i32_68 = arith.constant 0 : i32
      %c0_i32_69 = arith.constant 0 : i32
      %88 = tpu.memref_slice %arg8[%84, %c0_i32_67, %c0_i32_68, %c0_i32_69] : memref<2x10x18x128xf32, #tpu.memory_space<vmem>> -> memref<1x10x18x128xf32, #tpu.memory_space<vmem>>
      %89 = tpu.memref_squeeze %88 : memref<1x10x18x128xf32, #tpu.memory_space<vmem>> -> memref<10x18x128xf32, #tpu.memory_space<vmem>>
      %90 = tpu.memref_slice %arg9[%84] : memref<2x!tpu.dma_semaphore, #tpu.memory_space<semaphore_mem>> -> memref<1x!tpu.dma_semaphore, #tpu.memory_space<semaphore_mem>>
      %91 = tpu.memref_squeeze %90 : memref<1x!tpu.dma_semaphore, #tpu.memory_space<semaphore_mem>> -> memref<!tpu.dma_semaphore, #tpu.memory_space<semaphore_mem>>
      tpu.enqueue_dma source(%87 : memref<10x18x128xf32, #tpu.memory_space<any>>) target(%89 : memref<10x18x128xf32, #tpu.memory_space<vmem>>) target_semaphore(%91 : memref<!tpu.dma_semaphore, #tpu.memory_space<semaphore_mem>>)
    } else {
    }
    %c0 = arith.constant 0 : index
    %c0_8 = arith.constant 0 : index
    %c0_9 = arith.constant 0 : index
    %15 = vector.load %arg5[%c0, %c0_8, %c0_9] : memref<1x1x128xf32, #tpu.memory_space<vmem>>, vector<1x1x128xf32>
    %16 = arith.index_cast %0 : i32 to index
    %c0_10 = arith.constant 0 : index
    %c0_11 = arith.constant 0 : index
    %c0_12 = arith.constant 0 : index
    %17 = vector.load %arg8[%16, %c0_10, %c0_11, %c0_12] : memref<2x10x18x128xf32, #tpu.memory_space<vmem>>, vector<1x10x18x128xf32>
    %18 = vector.shape_cast %17 : vector<1x10x18x128xf32> to vector<10x18x128xf32>
    %19 = vector.broadcast %15 : vector<1x1x128xf32> to vector<10x18x128xf32>
    %20 = arith.mulf %18, %19 : vector<10x18x128xf32>
    %21 = vector.extract_strided_slice %20 {offsets = [0, 0, 0], sizes = [8, 18, 128], strides = [1, 1, 1]} : vector<10x18x128xf32> to vector<8x18x128xf32>
    %22 = vector.extract_strided_slice %21 {offsets = [0, 0, 0], sizes = [8, 16, 128], strides = [1, 1, 1]} : vector<8x18x128xf32> to vector<8x16x128xf32>
    %23 = vector.shape_cast %22 : vector<8x16x128xf32> to vector<128x128xf32>
    %c0_13 = arith.constant 0 : index
    %c0_14 = arith.constant 0 : index
    %c0_15 = arith.constant 0 : index
    %c0_16 = arith.constant 0 : index
    %24 = vector.load %arg4[%c0_13, %c0_14, %c0_15, %c0_16] : memref<3x3x128x128xf32, #tpu.memory_space<vmem>>, vector<1x1x128x128xf32>
    %25 = vector.shape_cast %24 : vector<1x1x128x128xf32> to vector<128x128xf32>
    %cst = arith.constant dense<0.000000e+00> : vector<128x128xf32>
    %26 = tpu.matmul %23, %25, %cst {dimension_numbers = #tpu.dot_dimension_numbers<[1], [0], [0], [1], [0, 0, 1, 1], [], []>} : vector<128x128xf32>, vector<128x128xf32>, vector<128x128xf32> -> vector<128x128xf32>
    %27 = vector.extract_strided_slice %21 {offsets = [0, 1, 0], sizes = [8, 16, 128], strides = [1, 1, 1]} : vector<8x18x128xf32> to vector<8x16x128xf32>
    %28 = vector.shape_cast %27 : vector<8x16x128xf32> to vector<128x128xf32>
    %c0_17 = arith.constant 0 : index
    %c1 = arith.constant 1 : index
    %c0_18 = arith.constant 0 : index
    %c0_19 = arith.constant 0 : index
    %29 = vector.load %arg4[%c0_17, %c1, %c0_18, %c0_19] : memref<3x3x128x128xf32, #tpu.memory_space<vmem>>, vector<1x1x128x128xf32>
    %30 = vector.shape_cast %29 : vector<1x1x128x128xf32> to vector<128x128xf32>
    %cst_20 = arith.constant dense<0.000000e+00> : vector<128x128xf32>
    %31 = tpu.matmul %28, %30, %cst_20 {dimension_numbers = #tpu.dot_dimension_numbers<[1], [0], [0], [1], [0, 0, 1, 1], [], []>} : vector<128x128xf32>, vector<128x128xf32>, vector<128x128xf32> -> vector<128x128xf32>
    %32 = arith.addf %26, %31 : vector<128x128xf32>
    %33 = vector.extract_strided_slice %21 {offsets = [0, 2, 0], sizes = [8, 16, 128], strides = [1, 1, 1]} : vector<8x18x128xf32> to vector<8x16x128xf32>
    %34 = vector.shape_cast %33 : vector<8x16x128xf32> to vector<128x128xf32>
    %c0_21 = arith.constant 0 : index
    %c2 = arith.constant 2 : index
    %c0_22 = arith.constant 0 : index
    %c0_23 = arith.constant 0 : index
    %35 = vector.load %arg4[%c0_21, %c2, %c0_22, %c0_23] : memref<3x3x128x128xf32, #tpu.memory_space<vmem>>, vector<1x1x128x128xf32>
    %36 = vector.shape_cast %35 : vector<1x1x128x128xf32> to vector<128x128xf32>
    %cst_24 = arith.constant dense<0.000000e+00> : vector<128x128xf32>
    %37 = tpu.matmul %34, %36, %cst_24 {dimension_numbers = #tpu.dot_dimension_numbers<[1], [0], [0], [1], [0, 0, 1, 1], [], []>} : vector<128x128xf32>, vector<128x128xf32>, vector<128x128xf32> -> vector<128x128xf32>
    %38 = arith.addf %32, %37 : vector<128x128xf32>
    %39 = vector.extract_strided_slice %20 {offsets = [1, 0, 0], sizes = [8, 18, 128], strides = [1, 1, 1]} : vector<10x18x128xf32> to vector<8x18x128xf32>
    %40 = vector.extract_strided_slice %39 {offsets = [0, 0, 0], sizes = [8, 16, 128], strides = [1, 1, 1]} : vector<8x18x128xf32> to vector<8x16x128xf32>
    %41 = vector.shape_cast %40 : vector<8x16x128xf32> to vector<128x128xf32>
    %c1_25 = arith.constant 1 : index
    %c0_26 = arith.constant 0 : index
    %c0_27 = arith.constant 0 : index
    %c0_28 = arith.constant 0 : index
    %42 = vector.load %arg4[%c1_25, %c0_26, %c0_27, %c0_28] : memref<3x3x128x128xf32, #tpu.memory_space<vmem>>, vector<1x1x128x128xf32>
    %43 = vector.shape_cast %42 : vector<1x1x128x128xf32> to vector<128x128xf32>
    %cst_29 = arith.constant dense<0.000000e+00> : vector<128x128xf32>
    %44 = tpu.matmul %41, %43, %cst_29 {dimension_numbers = #tpu.dot_dimension_numbers<[1], [0], [0], [1], [0, 0, 1, 1], [], []>} : vector<128x128xf32>, vector<128x128xf32>, vector<128x128xf32> -> vector<128x128xf32>
    %45 = arith.addf %38, %44 : vector<128x128xf32>
    %46 = vector.extract_strided_slice %39 {offsets = [0, 1, 0], sizes = [8, 16, 128], strides = [1, 1, 1]} : vector<8x18x128xf32> to vector<8x16x128xf32>
    %47 = vector.shape_cast %46 : vector<8x16x128xf32> to vector<128x128xf32>
    %c1_30 = arith.constant 1 : index
    %c1_31 = arith.constant 1 : index
    %c0_32 = arith.constant 0 : index
    %c0_33 = arith.constant 0 : index
    %48 = vector.load %arg4[%c1_30, %c1_31, %c0_32, %c0_33] : memref<3x3x128x128xf32, #tpu.memory_space<vmem>>, vector<1x1x128x128xf32>
    %49 = vector.shape_cast %48 : vector<1x1x128x128xf32> to vector<128x128xf32>
    %cst_34 = arith.constant dense<0.000000e+00> : vector<128x128xf32>
    %50 = tpu.matmul %47, %49, %cst_34 {dimension_numbers = #tpu.dot_dimension_numbers<[1], [0], [0], [1], [0, 0, 1, 1], [], []>} : vector<128x128xf32>, vector<128x128xf32>, vector<128x128xf32> -> vector<128x128xf32>
    %51 = arith.addf %45, %50 : vector<128x128xf32>
    %52 = vector.extract_strided_slice %39 {offsets = [0, 2, 0], sizes = [8, 16, 128], strides = [1, 1, 1]} : vector<8x18x128xf32> to vector<8x16x128xf32>
    %53 = vector.shape_cast %52 : vector<8x16x128xf32> to vector<128x128xf32>
    %c1_35 = arith.constant 1 : index
    %c2_36 = arith.constant 2 : index
    %c0_37 = arith.constant 0 : index
    %c0_38 = arith.constant 0 : index
    %54 = vector.load %arg4[%c1_35, %c2_36, %c0_37, %c0_38] : memref<3x3x128x128xf32, #tpu.memory_space<vmem>>, vector<1x1x128x128xf32>
    %55 = vector.shape_cast %54 : vector<1x1x128x128xf32> to vector<128x128xf32>
    %cst_39 = arith.constant dense<0.000000e+00> : vector<128x128xf32>
    %56 = tpu.matmul %53, %55, %cst_39 {dimension_numbers = #tpu.dot_dimension_numbers<[1], [0], [0], [1], [0, 0, 1, 1], [], []>} : vector<128x128xf32>, vector<128x128xf32>, vector<128x128xf32> -> vector<128x128xf32>
    %57 = arith.addf %51, %56 : vector<128x128xf32>
    %58 = vector.extract_strided_slice %20 {offsets = [2, 0, 0], sizes = [8, 18, 128], strides = [1, 1, 1]} : vector<10x18x128xf32> to vector<8x18x128xf32>
    %59 = vector.extract_strided_slice %58 {offsets = [0, 0, 0], sizes = [8, 16, 128], strides = [1, 1, 1]} : vector<8x18x128xf32> to vector<8x16x128xf32>
    %60 = vector.shape_cast %59 : vector<8x16x128xf32> to vector<128x128xf32>
    %c2_40 = arith.constant 2 : index
    %c0_41 = arith.constant 0 : index
    %c0_42 = arith.constant 0 : index
    %c0_43 = arith.constant 0 : index
    %61 = vector.load %arg4[%c2_40, %c0_41, %c0_42, %c0_43] : memref<3x3x128x128xf32, #tpu.memory_space<vmem>>, vector<1x1x128x128xf32>
    %62 = vector.shape_cast %61 : vector<1x1x128x128xf32> to vector<128x128xf32>
    %cst_44 = arith.constant dense<0.000000e+00> : vector<128x128xf32>
    %63 = tpu.matmul %60, %62, %cst_44 {dimension_numbers = #tpu.dot_dimension_numbers<[1], [0], [0], [1], [0, 0, 1, 1], [], []>} : vector<128x128xf32>, vector<128x128xf32>, vector<128x128xf32> -> vector<128x128xf32>
    %64 = arith.addf %57, %63 : vector<128x128xf32>
    %65 = vector.extract_strided_slice %58 {offsets = [0, 1, 0], sizes = [8, 16, 128], strides = [1, 1, 1]} : vector<8x18x128xf32> to vector<8x16x128xf32>
    %66 = vector.shape_cast %65 : vector<8x16x128xf32> to vector<128x128xf32>
    %c2_45 = arith.constant 2 : index
    %c1_46 = arith.constant 1 : index
    %c0_47 = arith.constant 0 : index
    %c0_48 = arith.constant 0 : index
    %67 = vector.load %arg4[%c2_45, %c1_46, %c0_47, %c0_48] : memref<3x3x128x128xf32, #tpu.memory_space<vmem>>, vector<1x1x128x128xf32>
    %68 = vector.shape_cast %67 : vector<1x1x128x128xf32> to vector<128x128xf32>
    %cst_49 = arith.constant dense<0.000000e+00> : vector<128x128xf32>
    %69 = tpu.matmul %66, %68, %cst_49 {dimension_numbers = #tpu.dot_dimension_numbers<[1], [0], [0], [1], [0, 0, 1, 1], [], []>} : vector<128x128xf32>, vector<128x128xf32>, vector<128x128xf32> -> vector<128x128xf32>
    %70 = arith.addf %64, %69 : vector<128x128xf32>
    %71 = vector.extract_strided_slice %58 {offsets = [0, 2, 0], sizes = [8, 16, 128], strides = [1, 1, 1]} : vector<8x18x128xf32> to vector<8x16x128xf32>
    %72 = vector.shape_cast %71 : vector<8x16x128xf32> to vector<128x128xf32>
    %c2_50 = arith.constant 2 : index
    %c2_51 = arith.constant 2 : index
    %c0_52 = arith.constant 0 : index
    %c0_53 = arith.constant 0 : index
    %73 = vector.load %arg4[%c2_50, %c2_51, %c0_52, %c0_53] : memref<3x3x128x128xf32, #tpu.memory_space<vmem>>, vector<1x1x128x128xf32>
    %74 = vector.shape_cast %73 : vector<1x1x128x128xf32> to vector<128x128xf32>
    %cst_54 = arith.constant dense<0.000000e+00> : vector<128x128xf32>
    %75 = tpu.matmul %72, %74, %cst_54 {dimension_numbers = #tpu.dot_dimension_numbers<[1], [0], [0], [1], [0, 0, 1, 1], [], []>} : vector<128x128xf32>, vector<128x128xf32>, vector<128x128xf32> -> vector<128x128xf32>
    %76 = arith.addf %70, %75 : vector<128x128xf32>
    %c0_55 = arith.constant 0 : index
    %c0_56 = arith.constant 0 : index
    %c0_57 = arith.constant 0 : index
    %77 = vector.load %arg6[%c0_55, %c0_56, %c0_57] : memref<1x1x128xf32, #tpu.memory_space<vmem>>, vector<1x1x128xf32>
    %78 = vector.shape_cast %77 : vector<1x1x128xf32> to vector<1x128xf32>
    %79 = vector.broadcast %78 : vector<1x128xf32> to vector<128x128xf32>
    %80 = arith.mulf %76, %79 : vector<128x128xf32>
    %81 = vector.shape_cast %80 : vector<128x128xf32> to vector<1x8x16x128xf32>
    %c0_58 = arith.constant 0 : index
    %c0_59 = arith.constant 0 : index
    %c0_60 = arith.constant 0 : index
    %c0_61 = arith.constant 0 : index
    %82 = vector.load %arg7[%c0_58, %c0_59, %c0_60, %c0_61] : memref<1x8x16x128xf32, #tpu.memory_space<vmem>>, vector<1x8x16x128xf32>
    tpu.vector_store %arg7[%c0_58, %c0_59, %c0_60, %c0_61], %81 {strides = array<i32>} : memref<1x8x16x128xf32, #tpu.memory_space<vmem>>, vector<1x8x16x128xf32>,
    return
  }
  func.func @transform_1(%arg0: i32, %arg1: i32, %arg2: i32) -> (i32, i32, i32, i32) {
    %c0_i32 = arith.constant 0 : i32
    %c0_i32_0 = arith.constant 0 : i32
    %c0_i32_1 = arith.constant 0 : i32
    %c0_i32_2 = arith.constant 0 : i32
    return %c0_i32, %c0_i32_0, %c0_i32_1, %arg1 : i32, i32, i32, i32
  }
  func.func @transform_2(%arg0: i32, %arg1: i32, %arg2: i32) -> (i32, i32, i32) {
    %c0_i32 = arith.constant 0 : i32
    %c0_i32_0 = arith.constant 0 : i32
    %c0_i32_1 = arith.constant 0 : i32
    return %arg0, %c0_i32, %c0_i32_0 : i32, i32, i32
  }
  func.func @transform_3(%arg0: i32, %arg1: i32, %arg2: i32) -> (i32, i32, i32) {
    %c0_i32 = arith.constant 0 : i32
    %c0_i32_0 = arith.constant 0 : i32
    return %arg0, %c0_i32, %arg1 : i32, i32, i32
  }
  func.func @transform_4(%arg0: i32, %arg1: i32, %arg2: i32) -> (i32, i32, i32, i32) {
    %c0_i32 = arith.constant 0 : i32
    %c0_i32_0 = arith.constant 0 : i32
    return %arg0, %arg2, %c0_i32, %arg1 : i32, i32, i32, i32
  }
}

</mosaic_0001>

<bundles_post_ra>
// kernel: tpu_custom_call.1
= control target key start
LH: loop header
LB: loop body
LE: loop exit
PB: predicated region body
PF: predicated region fallthrough
CT: control target
= control target key end

     0   :  { %s5375_s0 = inlined_call_operand.vmem [shape: f32[2,18,18,128], index: 0, kind: input, shape index: {}]   ;;  %s5376_s1 = inlined_call_operand.vmem [shape: f32[3,3,128,128], index: 1, kind: input, shape index: {}]   ;;  %s5377_s2 = inlined_call_operand.vmem [shape: f32[2,1,128], index: 2, kind: input, shape index: {}]   ;;  %s5378_s3 = inlined_call_operand.vmem [shape: f32[2,1,128], index: 3, kind: input, shape index: {}]   ;;  %s5379_s4 = inlined_call_operand.hbm [shape: f32[2,16,16,128], index: 4, kind: output, shape index: {}]  }
   0x1   :  { %5384 = sst [smem:[#allocation15_spill]] %s5375_s0 }
   0x2   :  { %9 = vsyncpa [#allocation5], 0 }
   0x3   :  { %11 = vsyncpa [#allocation5 + $0x1], 0  ;;  %s4176_s15 = smov 0   ;;  %s4178_s16 = smov 0  }
   0x4   :  { %s4180_s17 = smov 0   ;;  %s4182_s18 = smov 0  }
   0x5   :  { %s4184_s19 = smov 0   ;;  %s4186_s20 = smov 0  }
   0x6   :  { %s4188_s21 = smov 0   ;;  %s4190_s22 = smov 0  }
   0x7 LB: > { %s2544_s23 = sadd.s32 4294967295, %s4146_s22   ;;  %s2545_s24 = sadd.s32 4294967294, %s4146_s22   ;;  %s4146_s22 = sphi %s4190_s22, %s17_s22   ;;  %s4142_s21 = sphi %s4188_s21, %s5408_s21   ;;  %s4138_s20 = sphi %s4186_s20, %s5407_s20   ;;  %s4134_s19 = sphi %s4184_s19, %s5406_s19   ;;  %s4130_s18 = sphi %s4182_s18, %s5405_s18   ;;  %s4126_s17 = sphi %s4180_s17, %s5404_s17   ;;  %s4122_s16 = sphi %s4178_s16, %s5403_s16   ;;  %s4118_s15 = sphi %s4176_s15, %s5402_s15  }
   0x8   : > { %s29_s25 = sadd.s32 1, %s4138_s20  ;;  %s36_s26 = sadd.s32 1, %s4142_s21 }
   0x9   : > { %p30_p0 = scmp.ge.s32.totalorder %s29_s25, 2  ;;  %p137_p1 = scmp.ne.s32.totalorder %s4126_s17, %s4122_s16 }
   0xa   : > { %p138_p2 = scmp.eq.s32.totalorder %s2544_s23, 3  ;;  %p143_p5 = scmp.ne.s32.totalorder %s4122_s16, %s4118_s15 }
   0xb   : > { %s5410_s25 = smov (%p30_p0, %s29_s25), 0  ;;  %s5412_s26 = smov (!%p30_p0, %s36_s26), %s4142_s21 }
   0xc   : > { %s121_s27 = ssub.s32 %s4138_s20, %s5410_s25  ;;  %p4227_p3 = por %p138_p2, %p137_p1 }
   0xd   : > { %p38_p4 = scmp.ge.s32.totalorder %s5412_s26, 2  ;;  %p144_p6 = scmp.eq.s32.totalorder %s2545_s24, 3 }
   0xe   : > { %p2548_p7 = scmp.ge.s32.totalorder %s4146_s22, 1  ;;  %p184_p9 = scmp.lt.s32.totalorder %s4146_s22, 5 }
   0xf   : > { %s5414_s26 = smov (%p38_p4, %s5412_s26), 0  ;;  %p4236_p8 = por %p144_p6, %p143_p5 }
  0x10   : > { %5386 = sst [smem:[#allocation10_spill]] %s5414_s26  ;;  %s120_s30 = ssub.s32 %s4142_s21, %s5414_s26 }
  0x11   : > { %s127_s5 = sadd.s32 1, %s4126_s17  ;;  %s122_s6 = sor.u32 %s121_s27, %s120_s30 }
  0x12   : > { %p185_p10 = pnand %p2548_p7, %p184_p9  ;;  %p125_p11 = scmp.eq.s32.totalorder %s122_s6, 0 }
  0x14   : > { %s4245_s7 = scalar_select %p125_p11, %s4126_s17, %s127_s5  }
  0x15   : > { %188 = sbr.rel (%p185_p10) target bundleno = 497 (0x1f1), region = 32 }
  0x1c   : > { %s5380_s8 = sand.u32 1, %s4122_s16   ;;  %p220_p12 = scmp.lt.s32.totalorder %s4134_s19, 1 }
  0x1d   : > { %s2549_s9 = sshll.u32 %s5380_s8, 7  ;;  %s4252_s10 = sand.u32 1, %s4130_s18 }
  0x1e   : > { %s4255_s11 = scalar_select %p220_p12, %s4134_s19, 1 }
  0x1f   : > { %s4265_s30 = scalar_lea.vmem [#allocation4], %s2549_s9  ;;  %p2550_p13 = scmp.ne.s32.totalorder %s4130_s18, 0 }
  0x20   : > { %s235_s5 = smul.u32 (!%p2550_p13), 432, %s4134_s19  ;;  %s5388_s0 = sld [smem:[#allocation15_spill]] (!%p2550_p13) }
  0x21   : > { %234 = sbr.rel (%p2550_p13) target bundleno = 57 (0x39), region = 36 }
  0x26   : > { %s4272_s26 = scalar_lea.vmem (!%p2550_p13), %s5388_s0, %s235_s5 }
  0x27   : > { %v292_v0 = vld [vmem:[%s4272_s26] sm:$0xff] (!%p2550_p13)  ;;  %v294_v1 = vld [vmem:[%s4272_s26 + $0x8] sm:$0xff] (!%p2550_p13)  ;;  %v296_v2 = vld [vmem:[%s4272_s26 + $0x18] sm:$0xff] (!%p2550_p13) }
  0x28   : > { %293 = vst [vmem:[#allocation2] sm:$0xff] %v292_v0  ;;  %295 = vst [vmem:[#allocation2 + $0x8] sm:$0xff] %v294_v1  ;;  %v298_v3 = vld [vmem:[%s4272_s26 + $0x20] sm:$0xff]  ;;  %v300_v4 = vld [vmem:[%s4272_s26 + $0x30] sm:$0xff] }
  0x29   : > { %297 = vst [vmem:[#allocation2 + $0x18] sm:$0xff] %v296_v2  ;;  %v302_v5 = vld [vmem:[%s4272_s26 + $0x38] sm:$0xff]  ;;  %299 = vst [vmem:[#allocation2 + $0x20] sm:$0xff] %v298_v3  ;;  %v304_v6 = vld [vmem:[%s4272_s26 + $0x48] sm:$0xff] }
  0x2a   : > { %301 = vst [vmem:[#allocation2 + $0x30] sm:$0xff] %v300_v4  ;;  %303 = vst [vmem:[#allocation2 + $0x38] sm:$0xff] %v302_v5  ;;  %v306_v7 = vld [vmem:[%s4272_s26 + $0x50] sm:$0xff]  ;;  %v308_v8 = vld [vmem:[%s4272_s26 + $0x60] sm:$0xff] }
  0x2b   : > { %305 = vst [vmem:[#allocation2 + $0x48] sm:$0xff] %v304_v6  ;;  %307 = vst [vmem:[#allocation2 + $0x50] sm:$0xff] %v306_v7  ;;  %v310_v9 = vld [vmem:[%s4272_s26 + $0x68] sm:$0xff]  ;;  %v312_v10 = vld [vmem:[%s4272_s26 + $0x78] sm:$0xff] }
  0x2c   : > { %309 = vst [vmem:[#allocation2 + $0x60] sm:$0xff] %v308_v8  ;;  %v314_v11 = vld [vmem:[%s4272_s26 + $0x80] sm:$0xff]  ;;  %311 = vst [vmem:[#allocation2 + $0x68] sm:$0xff] %v310_v9  ;;  %v316_v12 = vld [vmem:[%s4272_s26 + $0x90] sm:$0xff] }
  0x2d   : > { %313 = vst [vmem:[#allocation2 + $0x78] sm:$0xff] %v312_v10  ;;  %315 = vst [vmem:[#allocation2 + $0x80] sm:$0xff] %v314_v11  ;;  %v318_v13 = vld [vmem:[%s4272_s26 + $0x98] sm:$0xff]  ;;  %v320_v14 = vld [vmem:[%s4272_s26 + $0xa8] sm:$0xff] }
  0x2e   : > { %317 = vst [vmem:[#allocation2 + $0x90] sm:$0xff] %v316_v12  ;;  %319 = vst [vmem:[#allocation2 + $0x98] sm:$0xff] %v318_v13  ;;  %v322_v15 = vld [vmem:[%s4272_s26 + $0xb0] sm:$0xff]  ;;  %v324_v16 = vld [vmem:[%s4272_s26 + $0xc0] sm:$0xff] }
  0x2f   : > { %321 = vst [vmem:[#allocation2 + $0xa8] sm:$0xff] %v320_v14  ;;  %v326_v17 = vld [vmem:[%s4272_s26 + $0xc8] sm:$0xff]  ;;  %323 = vst [vmem:[#allocation2 + $0xb0] sm:$0xff] %v322_v15  ;;  %v328_v18 = vld [vmem:[%s4272_s26 + $0xd8] sm:$0xff] }
  0x30   : > { %325 = vst [vmem:[#allocation2 + $0xc0] sm:$0xff] %v324_v16  ;;  %327 = vst [vmem:[#allocation2 + $0xc8] sm:$0xff] %v326_v17  ;;  %v330_v19 = vld [vmem:[%s4272_s26 + $0xe0] sm:$0xff]  ;;  %v2551_v20 = vld [vmem:[%s4272_s26 + $0x10] sm:$0x3] }
  0x31   : > { %329 = vst [vmem:[#allocation2 + $0xd8] sm:$0xff] %v328_v18  ;;  %331 = vst [vmem:[#allocation2 + $0xe0] sm:$0xff] %v330_v19  ;;  %v2552_v21 = vld [vmem:[%s4272_s26 + $0x28] sm:$0x3]  ;;  %v2553_v22 = vld [vmem:[%s4272_s26 + $0x40] sm:$0x3] }
  0x32   : > { %342 = vst [vmem:[#allocation2 + $0x10] sm:$0x3] %v2551_v20  ;;  %v2554_v23 = vld [vmem:[%s4272_s26 + $0x58] sm:$0x3]  ;;  %344 = vst [vmem:[#allocation2 + $0x28] sm:$0x3] %v2552_v21 }
  0x33   : > { %346 = vst [vmem:[#allocation2 + $0x40] sm:$0x3] %v2553_v22  ;;  %348 = vst [vmem:[#allocation2 + $0x58] sm:$0x3] %v2554_v23  ;;  %v2555_v24 = vld [vmem:[%s4272_s26 + $0x70] sm:$0x3] }
  0x34   : > { %v2556_v25 = vld [vmem:[%s4272_s26 + $0x88] sm:$0x3]  ;;  %v2557_v26 = vld [vmem:[%s4272_s26 + $0xa0] sm:$0x3]  ;;  %350 = vst [vmem:[#allocation2 + $0x70] sm:$0x3] %v2555_v24 }
  0x35   : > { %352 = vst [vmem:[#allocation2 + $0x88] sm:$0x3] %v2556_v25  ;;  %354 = vst [vmem:[#allocation2 + $0xa0] sm:$0x3] %v2557_v26  ;;  %v2558_v27 = vld [vmem:[%s4272_s26 + $0xb8] sm:$0x3] }
  0x36   : > { %v2559_v28 = vld [vmem:[%s4272_s26 + $0xd0] sm:$0x3]  ;;  %v2560_v29 = vld [vmem:[%s4272_s26 + $0xe8] sm:$0x3]  ;;  %356 = vst [vmem:[#allocation2 + $0xb8] sm:$0x3] %v2558_v27 }
  0x37   : > { %358 = vst [vmem:[#allocation2 + $0xd0] sm:$0x3] %v2559_v28  ;;  %360 = vst [vmem:[#allocation2 + $0xe8] sm:$0x3] %v2560_v29 }
  0x38   : > { %364 = vsyncadd [#allocation3], 2880 }
  0x39 PF: > { %s365_s8 = smul.u32 240, %s4252_s10  ;;  %s367_s12 = scalar_lea.sflag [#allocation3], %s4252_s10 }
  0x3b   : > { %s4305_s9 = scalar_lea.vmem [#allocation2], %s365_s8 }
  0x3c   : > { %4110 = dma.done.wait %s367_s12, 2880 }
  0x3d   : > { %4111 = vsyncadd %s367_s12, 4294964416  ;;  %s372_s13 = sadd.s32 1, %s4130_s18 }
  0x3e   : > { %p2561_p0 = scmp.ge.s32.totalorder %s372_s13, 2 }
  0x3f   : > { %s377_s26 = ssub.s32 (!%p2561_p0), 1, %s4252_s10  ;;  %s2441_s23 = smul.u32 (!%p2561_p0), 192, %s4130_s18 }
  0x40   : > { %376 = sbr.rel (%p2561_p0) target bundleno = 89 (0x59), region = 77  ;;  %s5389_s0 = sld [smem:[#allocation15_spill]] (!%p2561_p0) }
  0x41   : > { %s2442_s24 = smul.u32 (!%p2561_p0), 432, %s4134_s19  ;;  %s385_s27 = scalar_lea.sflag (!%p2561_p0), [#allocation3], %s377_s26 }
  0x42   : > { %s383_s5 = smul.u32 (!%p2561_p0), 240, %s377_s26 }
  0x43   : > { %s2443_s6 = sadd.s32 (!%p2561_p0), %s2442_s24, %s2441_s23 }
  0x44   : > { %s4322_s12 = scalar_lea.vmem (!%p2561_p0), [#allocation2], %s383_s5 }
  0x46   : > { %s4317_s14 = scalar_lea.vmem (!%p2561_p0), %s5389_s0, %s2443_s6 }
  0x47   : > { %v2563_v30 = vld [vmem:[%s4317_s14 + $0xc0] sm:$0xff]  ;;  %v2564_v31 = vld [vmem:[%s4317_s14 + $0xc8] sm:$0xff]  ;;  %v2565_v32 = vld [vmem:[%s4317_s14 + $0xd8] sm:$0xff] }
  0x48   : > { %442 = vst [vmem:[%s4322_s12] sm:$0xff] %v2563_v30  ;;  %444 = vst [vmem:[%s4322_s12 + $0x8] sm:$0xff] %v2564_v31  ;;  %v2566_v33 = vld [vmem:[%s4317_s14 + $0xe0] sm:$0xff]  ;;  %v2567_v34 = vld [vmem:[%s4317_s14 + $0xf0] sm:$0xff] }
  0x49   : > { %446 = vst [vmem:[%s4322_s12 + $0x18] sm:$0xff] %v2565_v32  ;;  %v2568_v35 = vld [vmem:[%s4317_s14 + $0xf8] sm:$0xff]  ;;  %448 = vst [vmem:[%s4322_s12 + $0x20] sm:$0xff] %v2566_v33  ;;  %v2569_v36 = vld [vmem:[%s4317_s14 + $0x108] sm:$0xff] }
  0x4a   : > { %450 = vst [vmem:[%s4322_s12 + $0x30] sm:$0xff] %v2567_v34  ;;  %452 = vst [vmem:[%s4322_s12 + $0x38] sm:$0xff] %v2568_v35  ;;  %v2570_v37 = vld [vmem:[%s4317_s14 + $0x110] sm:$0xff]  ;;  %v2571_v38 = vld [vmem:[%s4317_s14 + $0x120] sm:$0xff] }
  0x4b   : > { %454 = vst [vmem:[%s4322_s12 + $0x48] sm:$0xff] %v2569_v36  ;;  %456 = vst [vmem:[%s4322_s12 + $0x50] sm:$0xff] %v2570_v37  ;;  %v2572_v39 = vld [vmem:[%s4317_s14 + $0x128] sm:$0xff]  ;;  %v2573_v40 = vld [vmem:[%s4317_s14 + $0x138] sm:$0xff] }
  0x4c   : > { %458 = vst [vmem:[%s4322_s12 + $0x60] sm:$0xff] %v2571_v38  ;;  %v2574_v41 = vld [vmem:[%s4317_s14 + $0x140] sm:$0xff]  ;;  %460 = vst [vmem:[%s4322_s12 + $0x68] sm:$0xff] %v2572_v39  ;;  %v2575_v42 = vld [vmem:[%s4317_s14 + $0x150] sm:$0xff] }
  0x4d   : > { %462 = vst [vmem:[%s4322_s12 + $0x78] sm:$0xff] %v2573_v40  ;;  %464 = vst [vmem:[%s4322_s12 + $0x80] sm:$0xff] %v2574_v41  ;;  %v2576_v43 = vld [vmem:[%s4317_s14 + $0x158] sm:$0xff]  ;;  %v2577_v44 = vld [vmem:[%s4317_s14 + $0x168] sm:$0xff] }
  0x4e   : > { %466 = vst [vmem:[%s4322_s12 + $0x90] sm:$0xff] %v2575_v42  ;;  %468 = vst [vmem:[%s4322_s12 + $0x98] sm:$0xff] %v2576_v43  ;;  %v2578_v45 = vld [vmem:[%s4317_s14 + $0x170] sm:$0xff]  ;;  %v2579_v46 = vld [vmem:[%s4317_s14 + $0x180] sm:$0xff] }
  0x4f   : > { %470 = vst [vmem:[%s4322_s12 + $0xa8] sm:$0xff] %v2577_v44  ;;  %v2580_v47 = vld [vmem:[%s4317_s14 + $0x188] sm:$0xff]  ;;  %472 = vst [vmem:[%s4322_s12 + $0xb0] sm:$0xff] %v2578_v45  ;;  %v2581_v48 = vld [vmem:[%s4317_s14 + $0x198] sm:$0xff] }
  0x50   : > { %474 = vst [vmem:[%s4322_s12 + $0xc0] sm:$0xff] %v2579_v46  ;;  %476 = vst [vmem:[%s4322_s12 + $0xc8] sm:$0xff] %v2580_v47  ;;  %v2582_v49 = vld [vmem:[%s4317_s14 + $0x1a0] sm:$0xff]  ;;  %v2583_v50 = vld [vmem:[%s4317_s14 + $0xd0] sm:$0x3] }
  0x51   : > { %478 = vst [vmem:[%s4322_s12 + $0xd8] sm:$0xff] %v2581_v48  ;;  %480 = vst [vmem:[%s4322_s12 + $0xe0] sm:$0xff] %v2582_v49  ;;  %v2585_v51 = vld [vmem:[%s4317_s14 + $0xe8] sm:$0x3]  ;;  %v2587_v52 = vld [vmem:[%s4317_s14 + $0x100] sm:$0x3] }
  0x52   : > { %2584 = vst [vmem:[%s4322_s12 + $0x10] sm:$0x3] %v2583_v50  ;;  %v2589_v53 = vld [vmem:[%s4317_s14 + $0x118] sm:$0x3]  ;;  %2586 = vst [vmem:[%s4322_s12 + $0x28] sm:$0x3] %v2585_v51 }
  0x53   : > { %2588 = vst [vmem:[%s4322_s12 + $0x40] sm:$0x3] %v2587_v52  ;;  %2590 = vst [vmem:[%s4322_s12 + $0x58] sm:$0x3] %v2589_v53  ;;  %v2591_v54 = vld [vmem:[%s4317_s14 + $0x130] sm:$0x3] }
  0x54   : > { %v2593_v55 = vld [vmem:[%s4317_s14 + $0x148] sm:$0x3]  ;;  %v2595_v56 = vld [vmem:[%s4317_s14 + $0x160] sm:$0x3]  ;;  %2592 = vst [vmem:[%s4322_s12 + $0x70] sm:$0x3] %v2591_v54 }
  0x55   : > { %2594 = vst [vmem:[%s4322_s12 + $0x88] sm:$0x3] %v2593_v55  ;;  %2596 = vst [vmem:[%s4322_s12 + $0xa0] sm:$0x3] %v2595_v56  ;;  %v2597_v57 = vld [vmem:[%s4317_s14 + $0x178] sm:$0x3] }
  0x56   : > { %v2599_v58 = vld [vmem:[%s4317_s14 + $0x190] sm:$0x3]  ;;  %v2601_v59 = vld [vmem:[%s4317_s14 + $0x1a8] sm:$0x3]  ;;  %2598 = vst [vmem:[%s4322_s12 + $0xb8] sm:$0x3] %v2597_v57 }
  0x57   : > { %2600 = vst [vmem:[%s4322_s12 + $0xd0] sm:$0x3] %v2599_v58  ;;  %2602 = vst [vmem:[%s4322_s12 + $0xe8] sm:$0x3] %v2601_v59 }
  0x58   : > { %513 = vsyncadd %s385_s27, 2880 }
  0x59 PF: > { %v2614_v60 = vld [vmem:[%s5376_s1 + $0x80] sm:$0xff]  ;;  %v2615_v61 = vld [vmem:[%s5376_s1 + $0x88] sm:$0xff]  ;;  %v2616_v1 = vld [vmem:[%s5376_s1 + $0x90] sm:$0xff]  ;;  %s5390_s8 = scalar_lea.vmem %s5377_s2, %s4255_s11  ;;  %vm621_vm0 = vcmask 1046528   ;;  %vm985_vm1 = vcmask 1045504   ;;  %s5399_s0 = scalar_lea.vmem %s5378_s3, %s4255_s11 }
  0x5a   : > { %v2662_v62 = vld [vmem:[%s5376_s1 + $0x200] sm:$0xff]  ;;  %v3545_v63 = vpack.c.bf16 %v2615_v61, %v2614_v60  ;;  %v2663_v0 = vld [vmem:[%s5376_s1 + $0x208] sm:$0xff]  ;;  %v2617_v2 = vld [vmem:[%s5376_s1 + $0x98] sm:$0xff]  ;;  %s2752_s11 = sshll.u32 %s4130_s18, 4  ;;  %s2746_s6 = sshll.u32 %s4134_s19, 5 }
  0x5b   : > { %v3673_v3 = vpack.c.bf16 %v2663_v0, %v2662_v62  ;;  %v3549_v4 = vpack.c.bf16 %v2617_v2, %v2616_v1  ;;  %v2664_v5 = vld [vmem:[%s5376_s1 + $0x210] sm:$0xff]  ;;  %v2665_v6 = vld [vmem:[%s5376_s1 + $0x218] sm:$0xff]  ;;  %v2618_v7 = vld [vmem:[%s5376_s1 + $0xa0] sm:$0xff]  ;;  %s2376_s18 = sadd.s32 %s2752_s11, %s2746_s6  ;;  %s5400_s12 = sand.u32 1, %s4122_s16  }
  0x5c   : > { %3546 = vmatprep.subr.bf16.mxu1 %v3545_v63  ;;  %v3677_v8 = vpack.c.bf16 %v2665_v6, %v2664_v5  ;;  %v2619_v9 = vld [vmem:[%s5376_s1 + $0xa8] sm:$0xff]  ;;  %v2666_v10 = vld [vmem:[%s5376_s1 + $0x220] sm:$0xff]  ;;  %v2620_v14 = vld [vmem:[%s5376_s1 + $0xb0] sm:$0xff]  ;;  %s2747_s19 = sshll.u32 %s2376_s18, 7  ;;  %s4148_s13 = smov [#allocation4]  }
  0x5d   : > { %v2667_v11 = vld [vmem:[%s5376_s1 + $0x228] sm:$0xff]  ;;  %3674 = vmatprep.subr.bf16.mxu0 %v3673_v3  ;;  %3548 = vmatpush3.bf16.msra.mxu1 %v3545_v63  ;;  %v3553_v12 = vpack.c.bf16 %v2619_v9, %v2618_v7  ;;  %v2621_v15 = vld [vmem:[%s5376_s1 + $0xb8] sm:$0xff]  ;;  %v2668_v16 = vld [vmem:[%s5376_s1 + $0x230] sm:$0xff]  ;;  %s5312_s26 = scalar_lea.hbm %s5379_s4, %s2747_s19  ;;  %s4054_s23 = sshll.u32 %s4148_s13, 4  ;;  %s4055_s23 = int_to_ptr.vmem [resolvable:$false] %s4054_s23 }
  0x5e   : > { %3676 = vmatpush3.bf16.msra.mxu0 %v3673_v3  ;;  %3550 = vmatprep.subr.bf16.mxu1 %v3549_v4  ;;  %v3681_v13 = vpack.c.bf16 %v2667_v11, %v2666_v10  ;;  %v2669_v17 = vld [vmem:[%s5376_s1 + $0x238] sm:$0xff]  ;;  %v3557_v18 = vpack.c.bf16 %v2621_v15, %v2620_v14  ;;  %v2622_v19 = vld [vmem:[%s5376_s1 + $0xc0] sm:$0xff]  ;;  %v2623_v20 = vld [vmem:[%s5376_s1 + $0xc8] sm:$0xff]  ;;  %s4056_s24 = scalar_lea.vmem %s4055_s23, 4096 }
  0x5f   : > { %3678 = vmatprep.subr.bf16.mxu0 %v3677_v8  ;;  %v3685_v21 = vpack.c.bf16 %v2669_v17, %v2668_v16  ;;  %v2670_v22 = vld [vmem:[%s5376_s1 + $0x240] sm:$0xff]  ;;  %v2671_v23 = vld [vmem:[%s5376_s1 + $0x248] sm:$0xff]  ;;  %v3561_v32 = vpack.c.bf16 %v2623_v20, %v2622_v19  ;;  %v2624_v35 = vld [vmem:[%s5376_s1 + $0xd0] sm:$0xff] }
  0x60   : > { %v4448_v24 = vld [vmem:[%s5390_s8] ss:$0 sm:$0xff]  ;;  %v516_v26 = vld [vmem:[%s4305_s9 + $0x8] sm:$0xff]  ;;  %v518_v27 = vld [vmem:[%s4305_s9 + $0x18] sm:$0xff]  ;;  %v3689_v34 = vpack.c.bf16 %v2671_v23, %v2670_v22  ;;  %s2379_s8 = sshll.u32 %s4265_s30, 4  ;;  %s5314_s8 = int_to_ptr.vmem [resolvable:$true] %s2379_s8 }
  0x61   : > { %3552 = vmatpush3.bf16.msra.mxu1 %v3549_v4  ;;  %v515_v25 = vld [vmem:[%s4305_s9] sm:$0xff]  ;;  %v4457_v29 = vmul.f32 %v4448_v24, %v516_v26  ;;  %v4461_v31 = vmul.f32 %v4448_v24, %v518_v27  ;;  %v2625_v36 = vld [vmem:[%s5376_s1 + $0xd8] sm:$0xff]  ;;  %v2627_v48 = vld [vmem:[%s5376_s1 + $0xe8] sm:$0xff]  ;;  %s4050_s27 = scalar_lea.vmem %s5314_s8, 2048  ;;  %p4057_p5 = scmp.lt.s32.totalorder %s5314_s8, %s4055_s23 }
  0x62   : > { %3680 = vmatpush3.bf16.msra.mxu0 %v3677_v8  ;;  %3554 = vmatprep.subr.bf16.mxu1 %v3553_v12  ;;  %v4454_v28 = vmul.f32 %v4448_v24, %v515_v25  ;;  %v519_v30 = vld [vmem:[%s4305_s9 + $0x20] sm:$0xff]  ;;  %v2673_v41 = vld [vmem:[%s5376_s1 + $0x258] sm:$0xff]  ;;  %v3565_v44 = vpack.c.bf16 %v2625_v36, %v2624_v35  ;;  %v2675_v50 = vld [vmem:[%s5376_s1 + $0x268] sm:$0xff]  ;;  %p4051_p1 = scmp.ne.s32.totalorder %s5314_s8, %s4050_s27  ;;  %p4058_p6 = scmp.lt.s32.totalorder %s4056_s24, %s4050_s27 }
  0x63   : > { %3682 = vmatprep.subr.bf16.mxu0 %v3681_v13  ;;  %v4464_v33 = vmul.f32 %v4448_v24, %v519_v30  ;;  %v623_v38 = vrot.slane %v4457_v29, 1  ;;  %v627_v39 = vrot.slane %v4461_v31, 1  ;;  %v2672_v40 = vld [vmem:[%s5376_s1 + $0x250] sm:$0xff]  ;;  %v2626_v47 = vld [vmem:[%s5376_s1 + $0xe0] sm:$0xff]  ;;  %v2629_v55 = vld [vmem:[%s5376_s1 + $0xf8] sm:$0xff] }
  0x64   : > { %v622_v37 = vrot.slane %v4454_v28, 1  ;;  %v3693_v46 = vpack.c.bf16 %v2673_v41, %v2672_v40  ;;  %v2674_v49 = vld [vmem:[%s5376_s1 + $0x260] sm:$0xff]  ;;  %v3569_v51 = vpack.c.bf16 %v2627_v48, %v2626_v47  ;;  %v2628_v54 = vld [vmem:[%s5376_s1 + $0xf0] sm:$0xff]  ;;  %v520_v56 = vld [vmem:[%s4305_s9 + $0x28] sm:$0x3]  ;;  %p4052_p2 = pnand %p4051_p1, %p4227_p3  ;;  %p4059_p7 = por %p4058_p6, %p4057_p5 }
  0x65   : > { %3556 = vmatpush3.bf16.msra.mxu1 %v3553_v12  ;;  %v628_v42 = vrot.slane %v4464_v33, 1  ;;  %v517_v52 = vld [vmem:[%s4305_s9 + $0x10] sm:$0x3]  ;;  %v3697_v53 = vpack.c.bf16 %v2675_v50, %v2674_v49  ;;  %v2677_v58 = vld [vmem:[%s5376_s1 + $0x278] sm:$0xff]  ;;  %v3573_v62 = vpack.c.bf16 %v2629_v55, %v2628_v54  ;;  %v4526_v0 = vmul.f32 %v4448_v24, %v520_v56  ;;  %v582_v2 = vld [vmem:[%s5376_s1 + $0x8] sm:$0xff] }
  0x66   : > { %3684 = vmatpush3.bf16.msra.mxu0 %v3681_v13  ;;  %3558 = vmatprep.subr.bf16.mxu1 %v3557_v18  ;;  %v624_v43 = vsel %vm621_vm0, %v622_v37, %v623_v38  ;;  %v2676_v57 = vld [vmem:[%s5376_s1 + $0x270] sm:$0xff]  ;;  %v4518_v59 = vmul.f32 %v4448_v24, %v517_v52  ;;  %v522_v61 = vld [vmem:[%s4305_s9 + $0x38] sm:$0xff]  ;;  %v581_v63 = vld [vmem:[%s5376_s1] sm:$0xff]  ;;  %p4053_p4 = pneg %p4052_p2 }
  0x67   : > { %3686 = vmatprep.subr.bf16.mxu0 %v3685_v21  ;;  %v4488_v45 = vsel %vm621_vm0, %v627_v39, %v628_v42  ;;  %3073 = vmatprep.mubr.f32.mxu1 %v624_v43  ;;  %v521_v60 = vld [vmem:[%s4305_s9 + $0x30] sm:$0xff]  ;;  %v3701_v1 = vpack.c.bf16 %v2677_v58, %v2676_v57  ;;  %v523_v4 = vld [vmem:[%s4305_s9 + $0x40] sm:$0x3]  ;;  %v2679_v5 = vld [vmem:[%s5376_s1 + $0x288] sm:$0xff]  ;;  %v4542_v7 = vmul.f32 %v4448_v24, %v522_v61  ;;  %v630_v12 = vrot.slane %v4526_v0, 1 }
  0x68   : > { %3297 = vmatprep.mubr.f32.mxu0 %v4488_v45  ;;  %v2678_v3 = vld [vmem:[%s5376_s1 + $0x280] sm:$0xff]  ;;  %v4539_v6 = vmul.f32 %v4448_v24, %v521_v60  ;;  %v524_v8 = vld [vmem:[%s4305_s9 + $0x48] sm:$0xff]  ;;  %v625_v10 = vrot.slane %v4518_v59, 1  ;;  %v3577_v11 = vpack.c.bf16 %v582_v2, %v581_v63  ;;  %v4549_v13 = vmul.f32 %v4448_v24, %v523_v4  ;;  %v526_v17 = vld [vmem:[%s4305_s9 + $0x58] sm:$0x3]  ;;  %p4060_p9 = pnand %p4059_p7, %p4053_p4 }
  0x69   : > { %3560 = vmatpush3.bf16.msra.mxu1 %v3557_v18  ;;  %v525_v9 = vld [vmem:[%s4305_s9 + $0x50] sm:$0xff]  ;;  %v3705_v14 = vpack.c.bf16 %v2679_v5, %v2678_v3  ;;  %v4552_v15 = vmul.f32 %v4448_v24, %v524_v8  ;;  %v633_v19 = vrot.slane %v4542_v7, 1  ;;  %v2681_v25 = vld [vmem:[%s5376_s1 + $0x298] sm:$0xff]  ;;  %v527_v26 = vld [vmem:[%s4305_s9 + $0x60] sm:$0xff]  ;;  %v631_v30 = vsel %vm621_vm0, %v628_v42, %v630_v12 }
  0x6a   : > { %3688 = vmatpush3.bf16.msra.mxu0 %v3685_v21  ;;  %3562 = vmatprep.subr.bf16.mxu1 %v3561_v32  ;;  %v4555_v16 = vmul.f32 %v4448_v24, %v525_v9  ;;  %v632_v18 = vrot.slane %v4539_v6, 1  ;;  %v583_v20 = vld [vmem:[%s5376_s1 + $0x10] sm:$0xff]  ;;  %v584_v21 = vld [vmem:[%s5376_s1 + $0x18] sm:$0xff]  ;;  %v626_v23 = vsel %vm621_vm0, %v623_v38, %v625_v10  ;;  %v585_v38 = vld [vmem:[%s5376_s1 + $0x20] sm:$0xff] }
  0x6b   : > { %3690 = vmatprep.subr.bf16.mxu0 %v3689_v34  ;;  %v2680_v22 = vld [vmem:[%s5376_s1 + $0x290] sm:$0xff]  ;;  %v528_v27 = vld [vmem:[%s4305_s9 + $0x68] sm:$0xff]  ;;  %v3581_v35 = vpack.c.bf16 %v584_v21, %v583_v20  ;;  %v637_v36 = vrot.slane %v4552_v15, 1  ;;  %v2682_v43 = vld [vmem:[%s5376_s1 + $0x2a0] sm:$0xff] }
  0x6c   : > { %v638_v37 = vrot.slane %v4555_v16, 1  ;;  %v529_v39 = vld [vmem:[%s4305_s9 + $0x70] sm:$0x3]  ;;  %v4591_v40 = vsel %vm621_vm0, %v632_v18, %v633_v19  ;;  %v3709_v41 = vpack.c.bf16 %v2681_v25, %v2680_v22  ;;  %v586_v42 = vld [vmem:[%s5376_s1 + $0x28] sm:$0xff]  ;;  %v4606_v47 = vmul.f32 %v4448_v24, %v528_v27  ;;  %v531_v49 = vld [vmem:[%s4305_s9 + $0x80] sm:$0xff] }
  0x6d   : > { %3564 = vmatpush3.bf16.msra.mxu1 %v3561_v32  ;;  %v635_v32 = vrot.slane %v4549_v13, 1  ;;  %v530_v48 = vld [vmem:[%s4305_s9 + $0x78] sm:$0xff]  ;;  %v4616_v52 = vmul.f32 %v4448_v24, %v529_v39  ;;  %v3585_v54 = vpack.c.bf16 %v586_v42, %v585_v38  ;;  %v532_v56 = vld [vmem:[%s4305_s9 + $0x88] sm:$0x3]  ;;  %v533_v63 = vld [vmem:[%s4305_s9 + $0x90] sm:$0xff] }
  0x6e   : > { %3692 = vmatpush3.bf16.msra.mxu0 %v3689_v34  ;;  %3566 = vmatprep.subr.bf16.mxu1 %v3565_v44  ;;  %v4582_v34 = vmul.f32 %v4448_v24, %v526_v17  ;;  %v643_v58 = vrot.slane %v4606_v47, 1  ;;  %v588_v60 = vld [vmem:[%s5376_s1 + $0x38] sm:$0xff]  ;;  %v4632_v61 = vmul.f32 %v4448_v24, %v530_v48  ;;  %v2684_v2 = vld [vmem:[%s5376_s1 + $0x2b0] sm:$0xff]  ;;  %v4652_v8 = vmul.f32 %v4448_v24, %v532_v56  ;;  %v589_v20 = vld [vmem:[%s5376_s1 + $0x40] sm:$0xff] }
  0x6f   : > { %3694 = vmatprep.subr.bf16.mxu0 %v3693_v46  ;;  %v4612_v50 = vsel %vm621_vm0, %v633_v19, %v635_v32  ;;  %v2685_v3 = vld [vmem:[%s5376_s1 + $0x2b8] sm:$0xff]  ;;  %v645_v5 = vrot.slane %v4616_v52, 1  ;;  %v4656_v10 = vmul.f32 %v4448_v24, %v533_v63  ;;  %v535_v12 = vld [vmem:[%s4305_s9 + $0xa0] sm:$0x3]  ;;  %v590_v21 = vld [vmem:[%s5376_s1 + $0x48] sm:$0xff]  ;;  %v986_v56 = vrot.slane %v4454_v28, 2 }
  0x70   : > { %v3717_v17 = vpack.c.bf16 %v2685_v3, %v2684_v2  ;;  %v647_v18 = vrot.slane %v4632_v61, 1  ;;  %v536_v22 = vld [vmem:[%s4305_s9 + $0xa8] sm:$0xff]  ;;  %v591_v32 = vld [vmem:[%s5376_s1 + $0x50] sm:$0xff]  ;;  %v538_v42 = vld [vmem:[%s4305_s9 + $0xb8] sm:$0x3] }
  0x71   : > { %3568 = vmatpush3.bf16.msra.mxu1 %v3565_v44  ;;  %v2683_v44 = vld [vmem:[%s5376_s1 + $0x2a8] sm:$0xff]  ;;  %v4685_v27 = vsel %vm621_vm0, %v643_v58, %v645_v5  ;;  %v652_v38 = vrot.slane %v4656_v10, 1  ;;  %v2688_v48 = vld [vmem:[%s5376_s1 + $0x2d0] sm:$0xff]  ;;  %v4728_v63 = vmul.f32 %v4448_v24, %v538_v42 }
  0x72   : > { %3696 = vmatpush3.bf16.msra.mxu0 %v3693_v46  ;;  %3570 = vmatprep.subr.bf16.mxu1 %v3569_v51  ;;  %v4603_v46 = vmul.f32 %v4448_v24, %v527_v26  ;;  %v3713_v55 = vpack.c.bf16 %v2683_v44, %v2682_v43  ;;  %v2687_v25 = vld [vmem:[%s5376_s1 + $0x2c8] sm:$0xff]  ;;  %v537_v26 = vld [vmem:[%s4305_s9 + $0xb0] sm:$0xff] }
  0x73   : > { %3698 = vmatprep.subr.bf16.mxu0 %v3697_v53 }
  0x74   : > { %v642_v57 = vrot.slane %v4603_v46, 1 }
  0x75   : > { %3572 = vmatpush3.bf16.msra.mxu1 %v3569_v51  ;;  %v640_v51 = vrot.slane %v4582_v34, 1 }
  0x76   : > { %3700 = vmatpush3.bf16.msra.mxu0 %v3697_v53  ;;  %3574 = vmatprep.subr.bf16.mxu1 %v3573_v62  ;;  %v4620_v53 = vsel %vm621_vm0, %v637_v36, %v638_v37  ;;  %v4695_v36 = vmul.f32 %v4448_v24, %v535_v12  ;;  %v594_v12 = vld [vmem:[%s5376_s1 + $0x68] sm:$0xff] }
  0x77   : > { %3702 = vmatprep.subr.bf16.mxu0 %v3701_v1  ;;  %v4648_v4 = vsel %vm621_vm0, %v638_v37, %v640_v51  ;;  %v3593_v37 = vpack.c.bf16 %v590_v21, %v589_v20  ;;  %v4715_v51 = vmul.f32 %v4448_v24, %v537_v26  ;;  %v2691_v20 = vld [vmem:[%s5376_s1 + $0x2e8] sm:$0xff]  ;;  %v543_v26 = vld [vmem:[%s4305_s9 + $0xe0] sm:$0xff] }
  0x79   : > { %3576 = vmatpush3.bf16.msra.mxu1 %v3573_v62  ;;  %v4635_v62 = vmul.f32 %v4448_v24, %v531_v49  ;;  %v2689_v49 = vld [vmem:[%s5376_s1 + $0x2d8] sm:$0xff] }
  0x7a   : > { %3704 = vmatpush3.bf16.msra.mxu0 %v3701_v1  ;;  %3578 = vmatprep.subr.bf16.mxu1 %v3577_v11  ;;  %v534_v1 = vld [vmem:[%s4305_s9 + $0x98] sm:$0xff]  ;;  %v3725_v3 = vpack.c.bf16 %v2689_v49, %v2688_v48 }
  0x7b   : > { %3706 = vmatprep.subr.bf16.mxu0 %v3705_v14  ;;  %v648_v19 = vrot.slane %v4635_v62, 1 }
  0x7c   : > { %3074 = vmatmul.mubr.f32.vlgmr.msra.gmra.mrb[0].mxu1 %v626_v23  ;;  %v2686_v23 = vld [vmem:[%s5376_s1 + $0x2c0] sm:$0xff] }
  0x7d   : > { %3298 = vmatmul.mubr.f32.vlgmr.msra.gmra.mrb[0].mxu0 %v631_v30  ;;  %3580 = vmatpush3.bf16.msra.mxu1 %v3577_v11  ;;  %v4659_v11 = vmul.f32 %v4448_v24, %v534_v1  ;;  %v4706_v43 = vsel %vm621_vm0, %v647_v18, %v648_v19  ;;  %v3721_v44 = vpack.c.bf16 %v2687_v25, %v2686_v23  ;;  %v989_v1 = vrot.slane %v4518_v59, 2  ;;  %v541_v59 = vld [vmem:[%s4305_s9 + $0xd0] sm:$0x3]  ;;  %v542_v25 = vld [vmem:[%s4305_s9 + $0xd8] sm:$0xff] }
  0x7e   : > { %3708 = vmatpush3.bf16.msra.mxu0 %v3705_v14  ;;  %3076 = vmatprep.mubr.f32.mxu1 %v4488_v45  ;;  %v587_v45 = vld [vmem:[%s5376_s1 + $0x30] sm:$0xff]  ;;  %v4664_v14 = vsel %vm621_vm0, %v642_v57, %v643_v58  ;;  %v987_v57 = vrot.slane %v4457_v29, 2  ;;  %v658_v18 = vrot.slane %v4715_v51, 1 }
  0x7f   : > { %3300 = vmatprep.mubr.f32.mxu0 %v4591_v40  ;;  %3582 = vmatprep.subr.bf16.mxu1 %v3581_v35  ;;  %v3589_v9 = vpack.c.bf16 %v588_v60, %v587_v45  ;;  %v653_v39 = vrot.slane %v4659_v11, 1  ;;  %v540_v45 = vld [vmem:[%s4305_s9 + $0xc8] sm:$0xff]  ;;  %v655_v60 = vrot.slane %v4695_v36, 1 }
  0x80   : > { %3077 = vmatmul.mubr.f32.gmra.mrb[2].mxu1 %v631_v30  ;;  %3710 = vmatprep.subr.bf16.mxu0 %v3709_v41  ;;  %v650_v30 = vrot.slane %v4652_v8, 1  ;;  %v4761_v23 = vsel %vm985_vm1, %v987_v57, %v989_v1 }
  0x81   : > { %3301 = vmatmul.mubr.f32.gmra.mrb[2].mxu0 %v4612_v50  ;;  %3584 = vmatpush3.bf16.msra.mxu1 %v3581_v35  ;;  %v592_v35 = vld [vmem:[%s5376_s1 + $0x58] sm:$0xff]  ;;  %v4733_v2 = vsel %vm621_vm0, %v652_v38, %v653_v39 }
  0x82   : > { %3712 = vmatpush3.bf16.msra.mxu0 %v3709_v41  ;;  %3079 = vmatprep.mubr.f32.mxu1 %v4591_v40  ;;  %v4701_v41 = vmul.f32 %v4448_v24, %v536_v22  ;;  %v4724_v58 = vsel %vm621_vm0, %v648_v19, %v650_v30  ;;  %5391 = vst [vmem:[#allocation11_spill] sm:$0xff] %v4733_v2  ;;  %v2690_v19 = vld [vmem:[%s5376_s1 + $0x2e0] sm:$0xff] }
  0x83   : > { %3303 = vmatprep.mubr.f32.mxu0 %v4620_v53  ;;  %3586 = vmatprep.subr.bf16.mxu1 %v3585_v54  ;;  %v4758_v22 = vmul.f32 %v4448_v24, %v540_v45  ;;  %v4768_v30 = vsel %vm621_vm0, %v653_v39, %v655_v60  ;;  %v3729_v42 = vpack.c.bf16 %v2691_v20, %v2690_v19  ;;  %v2692_v45 = vld [vmem:[%s5376_s1 + $0x2f0] sm:$0xff] }
  0x84   : > { %3080 = vmatmul.mubr.f32.gmra.mrb[4].mxu1 %v4612_v50  ;;  %3714 = vmatprep.subr.bf16.mxu0 %v3713_v55  ;;  %v657_v5 = vrot.slane %v4701_v41, 1  ;;  %5392 = vst [vmem:[#allocation12_spill] sm:$0xff] %v4768_v30  ;;  %v4782_v39 = vmul.f32 %v4448_v24, %v542_v25  ;;  %v991_v25 = vrot.slane %v4461_v31, 2 }
  0x85   : > { %3304 = vmatmul.mubr.f32.gmra.mrb[4].mxu0 %v4648_v4  ;;  %3588 = vmatpush3.bf16.msra.mxu1 %v3585_v54  ;;  %v3597_v54 = vpack.c.bf16 %v592_v35, %v591_v32  ;;  %v660_v32 = vrot.slane %v4728_v63, 1  ;;  %v4772_v35 = vmul.f32 %v4448_v24, %v541_v59  ;;  %v544_v59 = vld [vmem:[%s4305_s9 + $0xe8] sm:$0x3] }
  0x86   : > { %3716 = vmatpush3.bf16.msra.mxu0 %v3713_v55  ;;  %3082 = vmatprep.mubr.f32.mxu1 %v4620_v53  ;;  %v539_v55 = vld [vmem:[%s4305_s9 + $0xc0] sm:$0xff]  ;;  %v4786_v48 = vsel %vm621_vm0, %v657_v5, %v658_v18  ;;  %v1952_v60 = vrot.slane %v4782_v39, 1  ;;  %v2137_v20 = vrot.slane %v4782_v39, 2  ;;  %s5323_s9 = scalar_lea.sflag [#allocation5], %s5400_s12 }
  0x87   : > { %3306 = vmatprep.mubr.f32.mxu0 %v4664_v14  ;;  %3590 = vmatprep.subr.bf16.mxu1 %v3589_v9  ;;  %v4755_v21 = vmul.f32 %v4448_v24, %v539_v55  ;;  %v1402_v55 = vrot.slane %v4758_v22, 1  ;;  %v4803_v1 = vsel %vm621_vm0, %v658_v18, %v660_v32  ;;  %v2630_v32 = vld [vmem:[%s5376_s1 + $0x100] sm:$0xff] }
  0x88   : > { %3083 = vmatmul.mubr.f32.gmra.mrb[6].mxu1 %v4648_v4  ;;  %3718 = vmatprep.subr.bf16.mxu0 %v3717_v17 }
  0x89   : > { %3307 = vmatmul.mubr.f32.gmra.mrb[6].mxu0 %v4685_v27  ;;  %3592 = vmatpush3.bf16.msra.mxu1 %v3589_v9  ;;  %v593_v9 = vld [vmem:[%s5376_s1 + $0x60] sm:$0xff]  ;;  %v1401_v49 = vrot.slane %v4755_v21, 1 }
  0x8a   : > { %3720 = vmatpush3.bf16.msra.mxu0 %v3717_v17  ;;  %3085 = vmatprep.mubr.f32.mxu1 %v4664_v14  ;;  %v4744_v17 = vsel %vm985_vm1, %v986_v56, %v987_v57  ;;  %v3601_v38 = vpack.c.bf16 %v594_v12, %v593_v9  ;;  %v2693_v56 = vld [vmem:[%s5376_s1 + $0x2f8] sm:$0xff]  ;;  %v4797_v57 = vmul.f32 %v4448_v24, %v543_v26  ;;  %v1404_v9 = vrot.slane %v4772_v35, 1 }
  0x8b   : > { %3309 = vmatprep.mubr.f32.mxu0 %v4706_v43  ;;  %3594 = vmatprep.subr.bf16.mxu1 %v3593_v37  ;;  %v3733_v19 = vpack.c.bf16 %v2693_v56, %v2692_v45  ;;  %v4814_v18 = vsel %vm621_vm0, %v1401_v49, %v1402_v55  ;;  %v992_v26 = vrot.slane %v4464_v33, 2  ;;  %v2695_v49 = vld [vmem:[%s5376_s1 + $0x308] sm:$0xff] }
  0x8c   : > { %3086 = vmatmul.mubr.f32.gmra.mrb[8].mxu1 %v4685_v27  ;;  %3722 = vmatprep.subr.bf16.mxu0 %v3721_v44  ;;  %v1953_v12 = vrot.slane %v4797_v57, 1 }
  0x8d   : > { %3310 = vmatmul.mubr.f32.gmra.mrb[8].mxu0 %v4724_v58  ;;  %3596 = vmatpush3.bf16.msra.mxu1 %v3593_v37  ;;  %v595_v37 = vld [vmem:[%s5376_s1 + $0x70] sm:$0xff] }
  0x8e   : > { %3724 = vmatpush3.bf16.msra.mxu0 %v3721_v44  ;;  %3088 = vmatprep.mubr.f32.mxu1 %v4706_v43  ;;  %v596_v44 = vld [vmem:[%s5376_s1 + $0x78] sm:$0xff] }
  0x8f   : > { %3312 = vmatprep.mubr.f32.mxu0 %v4733_v2  ;;  %3598 = vmatprep.subr.bf16.mxu1 %v3597_v54  ;;  %v3605_v5 = vpack.c.bf16 %v596_v44, %v595_v37  ;;  %v4825_v37 = vsel %vm621_vm0, %v1952_v60, %v1953_v12  ;;  %v2694_v44 = vld [vmem:[%s5376_s1 + $0x300] sm:$0xff]  ;;  %v4839_v60 = vsel %vm621_vm0, %v1402_v55, %v1404_v9  ;;  %v996_v9 = vrot.slane %v4539_v6, 2 }
  0x90   : > { %3089 = vmatmul.mubr.f32.gmra.mrb[10].mxu1 %v4724_v58  ;;  %3726 = vmatprep.subr.bf16.mxu0 %v3725_v3  ;;  %5393 = vst [vmem:[#allocation13_spill] sm:$0xff] %v4825_v37  ;;  %v3737_v55 = vpack.c.bf16 %v2695_v49, %v2694_v44  ;;  %v2699_v49 = vld [vmem:[%s5376_s1 + $0x328] sm:$0xff] }
  0x91   : > { %3313 = vmatmul.mubr.f32.gmra.mrb[10].mxu0 %v4768_v30  ;;  %3600 = vmatpush3.bf16.msra.mxu1 %v3597_v54  ;;  %v580_v54 = vmul.f32 %v4448_v24, %v544_v59  ;;  %v2631_v24 = vld [vmem:[%s5376_s1 + $0x108] sm:$0xff] }
  0x92   : > { %3728 = vmatpush3.bf16.msra.mxu0 %v3725_v3  ;;  %3091 = vmatprep.mubr.f32.mxu1 %v4733_v2  ;;  %v2138_v3 = vrot.slane %v4797_v57, 2  ;;  %v3609_v37 = vpack.c.bf16 %v2631_v24, %v2630_v32  ;;  %v999_v32 = vrot.slane %v4549_v13, 2  ;;  %v2635_v13 = vld [vmem:[%s5376_s1 + $0x128] sm:$0xff] }
  0x93   : > { %3315 = vmatprep.mubr.f32.mxu0 %v4786_v48  ;;  %3602 = vmatprep.subr.bf16.mxu1 %v3601_v38  ;;  %v1955_v45 = vrot.slane %v580_v54, 1  ;;  %v2140_v59 = vrot.slane %v580_v54, 2  ;;  %v2632_v54 = vld [vmem:[%s5376_s1 + $0x110] sm:$0xff] }
  0x94   : > { %3092 = vmatmul.mubr.f32.gmra.mrb[12].mxu1 %v4768_v30  ;;  %3730 = vmatprep.subr.bf16.mxu0 %v3729_v42  ;;  %v4835_v56 = vsel %vm985_vm1, %v2137_v20, %v2138_v3  ;;  %v2696_v20 = vld [vmem:[%s5376_s1 + $0x310] sm:$0xff] }
  0x95   : > { %3316 = vmatmul.mubr.f32.gmra.mrb[12].mxu0 %v4803_v1  ;;  %3604 = vmatpush3.bf16.msra.mxu1 %v3601_v38  ;;  %v994_v38 = vrot.slane %v4526_v0, 2  ;;  %v4844_v30 = vsel %vm621_vm0, %v1953_v12, %v1955_v45  ;;  %v4847_v2 = vsel %vm985_vm1, %v2138_v3, %v2140_v59  ;;  %v997_v0 = vrot.slane %v4542_v7, 2  ;;  %v2633_v12 = vld [vmem:[%s5376_s1 + $0x118] sm:$0xff] }
  0x96   : > { %3732 = vmatpush3.bf16.msra.mxu0 %v3729_v42  ;;  %3094 = vmatprep.mubr.f32.mxu1 %v4786_v48  ;;  %5394 = vst [vmem:[#allocation14_spill] sm:$0xff] %v4847_v2  ;;  %v4851_v42 = vsel %vm985_vm1, %v991_v25, %v992_v26  ;;  %v2697_v3 = vld [vmem:[%s5376_s1 + $0x318] sm:$0xff]  ;;  %v1004_v59 = vrot.slane %v4582_v34, 2  ;;  %v1587_v2 = vrot.slane %v4758_v22, 2 }
  0x97   : > { %3318 = vmatprep.mubr.f32.mxu0 %v4814_v18  ;;  %3606 = vmatprep.subr.bf16.mxu1 %v3605_v5  ;;  %v4870_v25 = vsel %vm985_vm1, %v992_v26, %v994_v38  ;;  %v4876_v24 = vsel %vm985_vm1, %v996_v9, %v997_v0  ;;  %v3741_v44 = vpack.c.bf16 %v2697_v3, %v2696_v20  ;;  %v2634_v26 = vld [vmem:[%s5376_s1 + $0x120] sm:$0xff]  ;;  %v2637_v34 = vld [vmem:[%s5376_s1 + $0x138] sm:$0xff] }
  0x98   : > { %3095 = vmatmul.mubr.f32.gmra.mrb[14].mxu1 %v4803_v1  ;;  %3734 = vmatprep.subr.bf16.mxu0 %v3733_v19  ;;  %v4895_v45 = vsel %vm985_vm1, %v997_v0, %v999_v32  ;;  %v2636_v0 = vld [vmem:[%s5376_s1 + $0x130] sm:$0xff]  ;;  %v2701_v20 = vld [vmem:[%s5376_s1 + $0x338] sm:$0xff]  ;;  %v1009_v32 = vrot.slane %v4616_v52, 2  ;;  %v2639_v52 = vld [vmem:[%s5376_s1 + $0x148] sm:$0xff] }
  0x99   : > { %3319 = vmatmul.mubr.f32.gmra.mrb[14].mxu0 %v4839_v60  ;;  %3608 = vmatpush3.bf16.msra.mxu1 %v3605_v5  ;;  %v3613_v5 = vpack.c.bf16 %v2633_v12, %v2632_v54  ;;  %v1007_v54 = vrot.slane %v4606_v47, 2  ;;  %v2700_v12 = vld [vmem:[%s5376_s1 + $0x330] sm:$0xff] }
  0x9a   : > { %3736 = vmatpush3.bf16.msra.mxu0 %v3733_v19  ;;  %3129 = vmatprep.mubr.f32.mxu1 %v4454_v28  ;;  %v1001_v19 = vrot.slane %v4552_v15, 2  ;;  %v1002_v28 = vrot.slane %v4555_v16, 2 }
  0x9b   : > { %3353 = vmatprep.mubr.f32.mxu0 %v4851_v42  ;;  %3610 = vmatprep.subr.bf16.mxu1 %v3609_v37 }
  0x9c   : > { %3130 = vmatmul.mubr.f32.vlgmr.msra.gmra.mrb[0].mxu1 %v4457_v29  ;;  %3738 = vmatprep.subr.bf16.mxu0 %v3737_v55  ;;  %v2698_v29 = vld [vmem:[%s5376_s1 + $0x320] sm:$0xff]  ;;  %v4901_v38 = vsel %vm985_vm1, %v1001_v19, %v1002_v28  ;;  %v4920_v3 = vsel %vm985_vm1, %v1002_v28, %v1004_v59  ;;  %v4945_v59 = vsel %vm985_vm1, %v1007_v54, %v1009_v32  ;;  %v2705_v32 = vld [vmem:[%s5376_s1 + $0x358] sm:$0xff] }
  0x9d   : > { %3354 = vmatmul.mubr.f32.vlgmr.msra.gmra.mrb[0].mxu0 %v4870_v25  ;;  %3612 = vmatpush3.bf16.msra.mxu1 %v3609_v37  ;;  %v3617_v37 = vpack.c.bf16 %v2635_v13, %v2634_v26  ;;  %v3745_v9 = vpack.c.bf16 %v2699_v49, %v2698_v29  ;;  %v3749_v26 = vpack.c.bf16 %v2701_v20, %v2700_v12  ;;  %v1012_v13 = vrot.slane %v4635_v62, 2  ;;  %v2638_v28 = vld [vmem:[%s5376_s1 + $0x140] sm:$0xff]  ;;  %v2703_v49 = vld [vmem:[%s5376_s1 + $0x348] sm:$0xff]  ;;  %v2704_v20 = vld [vmem:[%s5376_s1 + $0x350] sm:$0xff] }
  0x9e   : > { %3740 = vmatpush3.bf16.msra.mxu0 %v3737_v55  ;;  %3132 = vmatprep.mubr.f32.mxu1 %v4461_v31  ;;  %v1006_v55 = vrot.slane %v4603_v46, 2  ;;  %v2702_v29 = vld [vmem:[%s5376_s1 + $0x340] sm:$0xff]  ;;  %v1017_v12 = vrot.slane %v4659_v11, 2 }
  0x9f   : > { %3356 = vmatprep.mubr.f32.mxu0 %v4876_v24  ;;  %3614 = vmatprep.subr.bf16.mxu1 %v3613_v5 }
  0xa0   : > { %3133 = vmatmul.mubr.f32.gmra.mrb[2].mxu1 %v4464_v33  ;;  %3742 = vmatprep.subr.bf16.mxu0 %v3741_v44  ;;  %v4926_v19 = vsel %vm985_vm1, %v1006_v55, %v1007_v54  ;;  %v1014_v55 = vrot.slane %v4652_v8, 2  ;;  %v2640_v54 = vld [vmem:[%s5376_s1 + $0x150] sm:$0xff]  ;;  %v2641_v8 = vld [vmem:[%s5376_s1 + $0x158] sm:$0xff] }
  0xa1   : > { %3357 = vmatmul.mubr.f32.gmra.mrb[2].mxu0 %v4895_v45  ;;  %3616 = vmatpush3.bf16.msra.mxu1 %v3613_v5  ;;  %v3621_v5 = vpack.c.bf16 %v2637_v34, %v2636_v0  ;;  %v3753_v34 = vpack.c.bf16 %v2703_v49, %v2702_v29  ;;  %v3757_v29 = vpack.c.bf16 %v2705_v32, %v2704_v20  ;;  %v1022_v49 = vrot.slane %v4715_v51, 2 }
  0xa2   : > { %3744 = vmatpush3.bf16.msra.mxu0 %v3741_v44  ;;  %3135 = vmatprep.mubr.f32.mxu1 %v4539_v6  ;;  %v1011_v44 = vrot.slane %v4632_v61, 2 }
  0xa3   : > { %3359 = vmatprep.mubr.f32.mxu0 %v4901_v38  ;;  %3618 = vmatprep.subr.bf16.mxu1 %v3617_v37 }
  0xa4   : > { %3136 = vmatmul.mubr.f32.gmra.mrb[4].mxu1 %v4542_v7  ;;  %3746 = vmatprep.subr.bf16.mxu0 %v3745_v9  ;;  %v4951_v0 = vsel %vm985_vm1, %v1011_v44, %v1012_v13  ;;  %v4970_v44 = vsel %vm985_vm1, %v1012_v13, %v1014_v55  ;;  %v2642_v13 = vld [vmem:[%s5376_s1 + $0x160] sm:$0xff] }
  0xa5   : > { %3360 = vmatmul.mubr.f32.gmra.mrb[4].mxu0 %v4920_v3  ;;  %3620 = vmatpush3.bf16.msra.mxu1 %v3617_v37  ;;  %v3625_v37 = vpack.c.bf16 %v2639_v52, %v2638_v28  ;;  %v1019_v28 = vrot.slane %v4695_v36, 2  ;;  %v2643_v36 = vld [vmem:[%s5376_s1 + $0x168] sm:$0xff]  ;;  %v2706_v55 = vld [vmem:[%s5376_s1 + $0x360] sm:$0xff] }
  0xa6   : > { %3748 = vmatpush3.bf16.msra.mxu0 %v3745_v9  ;;  %3138 = vmatprep.mubr.f32.mxu1 %v4552_v15  ;;  %v1016_v9 = vrot.slane %v4656_v10, 2 }
  0xa7   : > { %3362 = vmatprep.mubr.f32.mxu0 %v4926_v19  ;;  %3622 = vmatprep.subr.bf16.mxu1 %v3621_v5 }
  0xa8   : > { %3139 = vmatmul.mubr.f32.gmra.mrb[6].mxu1 %v4555_v16  ;;  %3750 = vmatprep.subr.bf16.mxu0 %v3749_v26  ;;  %v4976_v52 = vsel %vm985_vm1, %v1016_v9, %v1017_v12  ;;  %v2707_v9 = vld [vmem:[%s5376_s1 + $0x368] sm:$0xff] }
  0xa9   : > { %3363 = vmatmul.mubr.f32.gmra.mrb[6].mxu0 %v4945_v59  ;;  %3624 = vmatpush3.bf16.msra.mxu1 %v3621_v5  ;;  %v3629_v5 = vpack.c.bf16 %v2641_v8, %v2640_v54  ;;  %v4995_v54 = vsel %vm985_vm1, %v1017_v12, %v1019_v28  ;;  %v1024_v8 = vrot.slane %v4728_v63, 2  ;;  %v3761_v32 = vpack.c.bf16 %v2707_v9, %v2706_v55  ;;  %v2644_v12 = vld [vmem:[%s5376_s1 + $0x170] sm:$0xff]  ;;  %v2645_v63 = vld [vmem:[%s5376_s1 + $0x178] sm:$0xff] }
  0xaa   : > { %3752 = vmatpush3.bf16.msra.mxu0 %v3749_v26  ;;  %3141 = vmatprep.mubr.f32.mxu1 %v4603_v46  ;;  %v1021_v26 = vrot.slane %v4701_v41, 2  ;;  %v2708_v28 = vld [vmem:[%s5376_s1 + $0x370] sm:$0xff] }
  0xab   : > { %3365 = vmatprep.mubr.f32.mxu0 %v4951_v0  ;;  %3626 = vmatprep.subr.bf16.mxu1 %v3625_v37 }
  0xac   : > { %3142 = vmatmul.mubr.f32.gmra.mrb[8].mxu1 %v4606_v47  ;;  %3754 = vmatprep.subr.bf16.mxu0 %v3753_v34  ;;  %v5001_v20 = vsel %vm985_vm1, %v1021_v26, %v1022_v49  ;;  %v2709_v26 = vld [vmem:[%s5376_s1 + $0x378] sm:$0xff] }
  0xad   : > { %3366 = vmatmul.mubr.f32.gmra.mrb[8].mxu0 %v4970_v44  ;;  %3628 = vmatpush3.bf16.msra.mxu1 %v3625_v37  ;;  %v3633_v37 = vpack.c.bf16 %v2643_v36, %v2642_v13  ;;  %v5020_v13 = vsel %vm985_vm1, %v1022_v49, %v1024_v8  ;;  %v1589_v36 = vrot.slane %v4772_v35, 2  ;;  %v3765_v9 = vpack.c.bf16 %v2709_v26, %v2708_v28  ;;  %v2647_v49 = vld [vmem:[%s5376_s1 + $0x188] sm:$0xff]  ;;  %v2710_v35 = vld [vmem:[%s5376_s1 + $0x380] sm:$0xff]  ;;  %v2713_v28 = vld [vmem:[%s5376_s1 + $0x398] sm:$0xff] }
  0xae   : > { %3756 = vmatpush3.bf16.msra.mxu0 %v3753_v34  ;;  %3144 = vmatprep.mubr.f32.mxu1 %v4632_v61  ;;  %v1586_v34 = vrot.slane %v4755_v21, 2  ;;  %v2711_v8 = vld [vmem:[%s5376_s1 + $0x388] sm:$0xff] }
  0xaf   : > { %3368 = vmatprep.mubr.f32.mxu0 %v4976_v52  ;;  %3630 = vmatprep.subr.bf16.mxu1 %v3629_v5 }
  0xb0   : > { %3145 = vmatmul.mubr.f32.gmra.mrb[10].mxu1 %v4635_v62  ;;  %3758 = vmatprep.subr.bf16.mxu0 %v3757_v29  ;;  %v5026_v55 = vsel %vm985_vm1, %v1586_v34, %v1587_v2  ;;  %v5043_v34 = vsel %vm985_vm1, %v1587_v2, %v1589_v36  ;;  %v2712_v2 = vld [vmem:[%s5376_s1 + $0x390] sm:$0xff] }
  0xb1   : > { %3369 = vmatmul.mubr.f32.gmra.mrb[10].mxu0 %v4995_v54  ;;  %3632 = vmatpush3.bf16.msra.mxu1 %v3629_v5  ;;  %v3637_v5 = vpack.c.bf16 %v2645_v63, %v2644_v12  ;;  %v2648_v63 = vld [vmem:[%s5376_s1 + $0x190] sm:$0xff]  ;;  %v3773_v36 = vpack.c.bf16 %v2713_v28, %v2712_v2  ;;  %v2718_v2 = vld [vmem:[%s5376_s1 + $0x3c0] sm:$0xff]  ;;  %v2719_v28 = vld [vmem:[%s5376_s1 + $0x3c8] sm:$0xff] }
  0xb2   : > { %3760 = vmatpush3.bf16.msra.mxu0 %v3757_v29  ;;  %3147 = vmatprep.mubr.f32.mxu1 %v4656_v10  ;;  %v2646_v29 = vld [vmem:[%s5376_s1 + $0x180] sm:$0xff] }
  0xb3   : > { %3371 = vmatprep.mubr.f32.mxu0 %v5001_v20  ;;  %3634 = vmatprep.subr.bf16.mxu1 %v3633_v37  ;;  %v3641_v12 = vpack.c.bf16 %v2647_v49, %v2646_v29  ;;  %v2651_v29 = vld [vmem:[%s5376_s1 + $0x1a8] sm:$0xff] }
  0xb4   : > { %3148 = vmatmul.mubr.f32.gmra.mrb[12].mxu1 %v4659_v11  ;;  %3762 = vmatprep.subr.bf16.mxu0 %v3761_v32 }
  0xb5   : > { %3372 = vmatmul.mubr.f32.gmra.mrb[12].mxu0 %v5020_v13  ;;  %3636 = vmatpush3.bf16.msra.mxu1 %v3633_v37  ;;  %v3769_v37 = vpack.c.bf16 %v2711_v8, %v2710_v35  ;;  %v2652_v35 = vld [vmem:[%s5376_s1 + $0x1b0] sm:$0xff]  ;;  %v2653_v8 = vld [vmem:[%s5376_s1 + $0x1b8] sm:$0xff] }
  0xb6   : > { %3764 = vmatpush3.bf16.msra.mxu0 %v3761_v32  ;;  %3150 = vmatprep.mubr.f32.mxu1 %v4701_v41  ;;  %v2649_v32 = vld [vmem:[%s5376_s1 + $0x198] sm:$0xff] }
  0xb7   : > { %3374 = vmatprep.mubr.f32.mxu0 %v5026_v55  ;;  %3638 = vmatprep.subr.bf16.mxu1 %v3637_v5  ;;  %v3645_v26 = vpack.c.bf16 %v2649_v32, %v2648_v63  ;;  %v2654_v63 = vld [vmem:[%s5376_s1 + $0x1c0] sm:$0xff]  ;;  %v2655_v32 = vld [vmem:[%s5376_s1 + $0x1c8] sm:$0xff] }
  0xb8   : > { %3151 = vmatmul.mubr.f32.gmra.mrb[14].mxu1 %v4715_v51  ;;  %3766 = vmatprep.subr.bf16.mxu0 %v3765_v9 }
  0xb9   : > { %3375 = vmatmul.mubr.f32.gmra.mrb[14].mxu0 %v5043_v34  ;;  %3640 = vmatpush3.bf16.msra.mxu1 %v3637_v5  ;;  %v2650_v5 = vld [vmem:[%s5376_s1 + $0x1a0] sm:$0xff] }
  0xba   : > { %3768 = vmatpush3.bf16.msra.mxu0 %v3765_v9  ;;  %3185 = vmatprep.mubr.f32.mxu1 %v4744_v17  ;;  %v2714_v17 = vld [vmem:[%s5376_s1 + $0x3a0] sm:$0xff]  ;;  %v3649_v9 = vpack.c.bf16 %v2651_v29, %v2650_v5  ;;  %v2656_v5 = vld [vmem:[%s5376_s1 + $0x1d0] sm:$0xff]  ;;  %v2657_v29 = vld [vmem:[%s5376_s1 + $0x1d8] sm:$0xff] }
  0xbb   : > { %3409 = vmatprep.mubr.f32.mxu0 %v4539_v6  ;;  %3642 = vmatprep.subr.bf16.mxu1 %v3641_v12 }
  0xbc   : > { %3186 = vmatmul.mubr.f32.vlgmr.msra.gmra.mrb[0].mxu1 %v4761_v23  ;;  %3770 = vmatprep.subr.bf16.mxu0 %v3769_v37  ;;  %v2715_v23 = vld [vmem:[%s5376_s1 + $0x3a8] sm:$0xff] }
  0xbd   : > { %3410 = vmatmul.mubr.f32.vlgmr.msra.gmra.mrb[0].mxu0 %v4542_v7  ;;  %3644 = vmatpush3.bf16.msra.mxu1 %v3641_v12  ;;  %v3777_v49 = vpack.c.bf16 %v2715_v23, %v2714_v17  ;;  %v3653_v12 = vpack.c.bf16 %v2653_v8, %v2652_v35  ;;  %v2720_v17 = vld [vmem:[%s5376_s1 + $0x3d0] sm:$0xff]  ;;  %v2721_v23 = vld [vmem:[%s5376_s1 + $0x3d8] sm:$0xff]  ;;  %v2658_v35 = vld [vmem:[%s5376_s1 + $0x1e0] sm:$0xff] }
  0xbe   : > { %3772 = vmatpush3.bf16.msra.mxu0 %v3769_v37  ;;  %3188 = vmatprep.mubr.f32.mxu1 %v4851_v42  ;;  %v2716_v42 = vld [vmem:[%s5376_s1 + $0x3b0] sm:$0xff]  ;;  %v2659_v8 = vld [vmem:[%s5376_s1 + $0x1e8] sm:$0xff] }
  0xbf   : > { %3412 = vmatprep.mubr.f32.mxu0 %v4552_v15  ;;  %3646 = vmatprep.subr.bf16.mxu1 %v3645_v26 }
  0xc0   : > { %3189 = vmatmul.mubr.f32.gmra.mrb[2].mxu1 %v4870_v25  ;;  %3774 = vmatprep.subr.bf16.mxu0 %v3773_v36  ;;  %v2717_v25 = vld [vmem:[%s5376_s1 + $0x3b8] sm:$0xff] }
  0xc1   : > { %3413 = vmatmul.mubr.f32.gmra.mrb[2].mxu0 %v4555_v16  ;;  %3648 = vmatpush3.bf16.msra.mxu1 %v3645_v26  ;;  %v3781_v37 = vpack.c.bf16 %v2717_v25, %v2716_v42  ;;  %v3657_v26 = vpack.c.bf16 %v2655_v32, %v2654_v63  ;;  %v2722_v42 = vld [vmem:[%s5376_s1 + $0x3e0] sm:$0xff]  ;;  %v2723_v25 = vld [vmem:[%s5376_s1 + $0x3e8] sm:$0xff]  ;;  %v2660_v63 = vld [vmem:[%s5376_s1 + $0x1f0] sm:$0xff] }
  0xc2   : > { %3776 = vmatpush3.bf16.msra.mxu0 %v3773_v36  ;;  %3191 = vmatprep.mubr.f32.mxu1 %v4876_v24  ;;  %v3785_v36 = vpack.c.bf16 %v2719_v28, %v2718_v2  ;;  %v2661_v32 = vld [vmem:[%s5376_s1 + $0x1f8] sm:$0xff]  ;;  %v2724_v2 = vld [vmem:[%s5376_s1 + $0x3f0] sm:$0xff] }
  0xc3   : > { %3415 = vmatprep.mubr.f32.mxu0 %v4603_v46  ;;  %3650 = vmatprep.subr.bf16.mxu1 %v3649_v9  ;;  %v2725_v28 = vld [vmem:[%s5376_s1 + $0x3f8] sm:$0xff] }
  0xc4   : > { %3192 = vmatmul.mubr.f32.gmra.mrb[4].mxu1 %v4895_v45  ;;  %3778 = vmatprep.subr.bf16.mxu0 %v3777_v49 }
  0xc5   : > { %3416 = vmatmul.mubr.f32.gmra.mrb[4].mxu0 %v4606_v47  ;;  %3652 = vmatpush3.bf16.msra.mxu1 %v3649_v9  ;;  %v3661_v9 = vpack.c.bf16 %v2657_v29, %v2656_v5  ;;  %v2726_v5 = vld [vmem:[%s5376_s1 + $0x400] sm:$0xff]  ;;  %v2727_v29 = vld [vmem:[%s5376_s1 + $0x408] sm:$0xff] }
  0xc6   : > { %3780 = vmatpush3.bf16.msra.mxu0 %v3777_v49  ;;  %3194 = vmatprep.mubr.f32.mxu1 %v4901_v38  ;;  %v3789_v49 = vpack.c.bf16 %v2721_v23, %v2720_v17  ;;  %v3801_v17 = vpack.c.bf16 %v2727_v29, %v2726_v5  ;;  %v2728_v23 = vld [vmem:[%s5376_s1 + $0x410] sm:$0xff] }
  0xc7   : > { %3418 = vmatprep.mubr.f32.mxu0 %v4632_v61  ;;  %3654 = vmatprep.subr.bf16.mxu1 %v3653_v12 }
  0xc8   : > { %3195 = vmatmul.mubr.f32.gmra.mrb[6].mxu1 %v4920_v3  ;;  %3782 = vmatprep.subr.bf16.mxu0 %v3781_v37 }
  0xc9   : > { %3419 = vmatmul.mubr.f32.gmra.mrb[6].mxu0 %v4635_v62  ;;  %3656 = vmatpush3.bf16.msra.mxu1 %v3653_v12  ;;  %v3665_v12 = vpack.c.bf16 %v2659_v8, %v2658_v35  ;;  %v2731_v35 = vld [vmem:[%s5376_s1 + $0x428] sm:$0xff] }
  0xca   : > { %3784 = vmatpush3.bf16.msra.mxu0 %v3781_v37  ;;  %3197 = vmatprep.mubr.f32.mxu1 %v4926_v19  ;;  %v3793_v37 = vpack.c.bf16 %v2723_v25, %v2722_v42 }
  0xcb   : > { %3421 = vmatprep.mubr.f32.mxu0 %v4656_v10  ;;  %3658 = vmatprep.subr.bf16.mxu1 %v3657_v26 }
  0xcc   : > { %3198 = vmatmul.mubr.f32.gmra.mrb[8].mxu1 %v4945_v59  ;;  %3786 = vmatprep.subr.bf16.mxu0 %v3785_v36 }
  0xcd   : > { %3422 = vmatmul.mubr.f32.gmra.mrb[8].mxu0 %v4659_v11  ;;  %3660 = vmatpush3.bf16.msra.mxu1 %v3657_v26  ;;  %v3669_v26 = vpack.c.bf16 %v2661_v32, %v2660_v63 }
  0xce   : > { %3788 = vmatpush3.bf16.msra.mxu0 %v3785_v36  ;;  %3200 = vmatprep.mubr.f32.mxu1 %v4951_v0  ;;  %v3797_v36 = vpack.c.bf16 %v2725_v28, %v2724_v2  ;;  %v5273_v2 = vld [vmem:[%s5399_s0] ss:$0 sm:$0xff] }
  0xcf   : > { %3424 = vmatprep.mubr.f32.mxu0 %v4701_v41  ;;  %3662 = vmatprep.subr.bf16.mxu1 %v3661_v9 }
  0xd0   : > { %3201 = vmatmul.mubr.f32.gmra.mrb[10].mxu1 %v4970_v44  ;;  %3790 = vmatprep.subr.bf16.mxu0 %v3789_v49 }
  0xd1   : > { %3425 = vmatmul.mubr.f32.gmra.mrb[10].mxu0 %v4715_v51  ;;  %3664 = vmatpush3.bf16.msra.mxu1 %v3661_v9  ;;  %v2729_v9 = vld [vmem:[%s5376_s1 + $0x418] sm:$0xff] }
  0xd2   : > { %3792 = vmatpush3.bf16.msra.mxu0 %v3789_v49  ;;  %3203 = vmatprep.mubr.f32.mxu1 %v4976_v52  ;;  %v2730_v49 = vld [vmem:[%s5376_s1 + $0x420] sm:$0xff] }
  0xd3   : > { %3427 = vmatprep.mubr.f32.mxu0 %v4755_v21  ;;  %3666 = vmatprep.subr.bf16.mxu1 %v3665_v12 }
  0xd4   : > { %3204 = vmatmul.mubr.f32.gmra.mrb[12].mxu1 %v4995_v54  ;;  %3794 = vmatprep.subr.bf16.mxu0 %v3793_v37 }
  0xd5   : > { %3428 = vmatmul.mubr.f32.gmra.mrb[12].mxu0 %v4758_v22  ;;  %3668 = vmatpush3.bf16.msra.mxu1 %v3665_v12 }
  0xd6   : > { %3796 = vmatpush3.bf16.msra.mxu0 %v3793_v37  ;;  %3206 = vmatprep.mubr.f32.mxu1 %v5001_v20 }
  0xd7   : > { %3430 = vmatprep.mubr.f32.mxu0 %v4782_v39  ;;  %3670 = vmatprep.subr.bf16.mxu1 %v3669_v26  ;;  %v3805_v39 = vpack.c.bf16 %v2729_v9, %v2728_v23 }
  0xd8   : > { %3207 = vmatmul.mubr.f32.gmra.mrb[14].mxu1 %v5020_v13  ;;  %3798 = vmatprep.subr.bf16.mxu0 %v3797_v36 }
  0xd9   : > { %3431 = vmatmul.mubr.f32.gmra.mrb[14].mxu0 %v4797_v57  ;;  %3672 = vmatpush3.bf16.msra.mxu1 %v3669_v26 }
  0xda   : > { %3800 = vmatpush3.bf16.msra.mxu0 %v3797_v36  ;;  %3241 = vmatprep.mubr.f32.mxu1 %v4461_v31  ;;  %v3809_v31 = vpack.c.bf16 %v2731_v35, %v2730_v49 }
  0xdb   : > { %3465 = vmatprep.mubr.f32.mxu0 %v4591_v40  ;;  %3802 = vmatprep.subr.bf16.mxu0 %v3801_v17  ;;  %v2733_v40 = vld [vmem:[%s5376_s1 + $0x438] sm:$0xff] }
  0xdc   : > { %3242 = vmatmul.mubr.f32.vlgmr.msra.gmra.mrb[0].mxu1 %v4464_v33  ;;  %3833 = vmatprep.subr.bf16.mxu1 %v3801_v17  ;;  %v2732_v33 = vld [vmem:[%s5376_s1 + $0x430] sm:$0xff] }
  0xdd   : > { %3466 = vmatmul.mubr.f32.vlgmr.msra.gmra.mrb[0].mxu0 %v4612_v50  ;;  %3841 = vmatpush3.bf16.msra.mxu1 %v3801_v17  ;;  %v2735_v50 = vld [vmem:[%s5376_s1 + $0x448] sm:$0xff] }
  0xde   : > { %3804 = vmatpush3.bf16.msra.mxu0 %v3801_v17  ;;  %3244 = vmatprep.mubr.f32.mxu1 %v4539_v6  ;;  %v3813_v6 = vpack.c.bf16 %v2733_v40, %v2732_v33 }
  0xdf   : > { %3468 = vmatprep.mubr.f32.mxu0 %v4620_v53  ;;  %3806 = vmatprep.subr.bf16.mxu0 %v3805_v39  ;;  %v2737_v53 = vld [vmem:[%s5376_s1 + $0x458] sm:$0xff] }
  0xe0   : > { %3245 = vmatmul.mubr.f32.gmra.mrb[2].mxu1 %v4542_v7  ;;  %3834 = vmatprep.subr.bf16.mxu1 %v3805_v39  ;;  %v2734_v7 = vld [vmem:[%s5376_s1 + $0x440] sm:$0xff] }
  0xe1   : > { %3469 = vmatmul.mubr.f32.gmra.mrb[2].mxu0 %v4648_v4  ;;  %3842 = vmatpush3.bf16.msra.mxu1 %v3805_v39 }
  0xe2   : > { %3808 = vmatpush3.bf16.msra.mxu0 %v3805_v39  ;;  %3247 = vmatprep.mubr.f32.mxu1 %v4552_v15  ;;  %v3817_v15 = vpack.c.bf16 %v2735_v50, %v2734_v7 }
  0xe3   : > { %3471 = vmatprep.mubr.f32.mxu0 %v4664_v14  ;;  %3810 = vmatprep.subr.bf16.mxu0 %v3809_v31  ;;  %v2739_v14 = vld [vmem:[%s5376_s1 + $0x468] sm:$0xff] }
  0xe4   : > { %3248 = vmatmul.mubr.f32.gmra.mrb[4].mxu1 %v4555_v16  ;;  %3835 = vmatprep.subr.bf16.mxu1 %v3809_v31  ;;  %v2736_v16 = vld [vmem:[%s5376_s1 + $0x450] sm:$0xff] }
  0xe5   : > { %3472 = vmatmul.mubr.f32.gmra.mrb[4].mxu0 %v4685_v27  ;;  %3843 = vmatpush3.bf16.msra.mxu1 %v3809_v31  ;;  %v3821_v4 = vpack.c.bf16 %v2737_v53, %v2736_v16  ;;  %v5396_v27 = vld [vmem:[#allocation12_spill] sm:$0xff] }
  0xe6   : > { %3812 = vmatpush3.bf16.msra.mxu0 %v3809_v31  ;;  %3250 = vmatprep.mubr.f32.mxu1 %v4603_v46  ;;  %v5395_v46 = vld [vmem:[#allocation11_spill] sm:$0xff] }
  0xe7   : > { %3474 = vmatprep.mubr.f32.mxu0 %v4706_v43  ;;  %3814 = vmatprep.subr.bf16.mxu0 %v3813_v6  ;;  %v2741_v43 = vld [vmem:[%s5376_s1 + $0x478] sm:$0xff] }
  0xe8   : > { %3251 = vmatmul.mubr.f32.gmra.mrb[6].mxu1 %v4606_v47  ;;  %3836 = vmatprep.subr.bf16.mxu1 %v3813_v6  ;;  %v2738_v47 = vld [vmem:[%s5376_s1 + $0x460] sm:$0xff] }
  0xe9   : > { %3475 = vmatmul.mubr.f32.gmra.mrb[6].mxu0 %v4724_v58  ;;  %3844 = vmatpush3.bf16.msra.mxu1 %v3813_v6 }
  0xea   : > { %3816 = vmatpush3.bf16.msra.mxu0 %v3813_v6  ;;  %3253 = vmatprep.mubr.f32.mxu1 %v4632_v61  ;;  %v3825_v61 = vpack.c.bf16 %v2739_v14, %v2738_v47 }
  0xeb   : > { %3477 = vmatprep.mubr.f32.mxu0 %v5395_v46  ;;  %3818 = vmatprep.subr.bf16.mxu0 %v3817_v15 }
  0xec   : > { %3254 = vmatmul.mubr.f32.gmra.mrb[8].mxu1 %v4635_v62  ;;  %3837 = vmatprep.subr.bf16.mxu1 %v3817_v15  ;;  %v2740_v62 = vld [vmem:[%s5376_s1 + $0x470] sm:$0xff] }
  0xed   : > { %3478 = vmatmul.mubr.f32.gmra.mrb[8].mxu0 %v5396_v27  ;;  %3845 = vmatpush3.bf16.msra.mxu1 %v3817_v15 }
  0xee   : > { %3820 = vmatpush3.bf16.msra.mxu0 %v3817_v15  ;;  %3256 = vmatprep.mubr.f32.mxu1 %v4656_v10  ;;  %v3829_v10 = vpack.c.bf16 %v2741_v43, %v2740_v62 }
  0xef   : > { %3480 = vmatprep.mubr.f32.mxu0 %v4786_v48  ;;  %3822 = vmatprep.subr.bf16.mxu0 %v3821_v4 }
  0xf0   : > { %3257 = vmatmul.mubr.f32.gmra.mrb[10].mxu1 %v4659_v11  ;;  %3838 = vmatprep.subr.bf16.mxu1 %v3821_v4  ;;  %v5397_v11 = vld [vmem:[#allocation13_spill] sm:$0xff] }
  0xf1   : > { %3481 = vmatmul.mubr.f32.gmra.mrb[10].mxu0 %v4803_v1  ;;  %3846 = vmatpush3.bf16.msra.mxu1 %v3821_v4 }
  0xf2   : > { %3824 = vmatpush3.bf16.msra.mxu0 %v3821_v4  ;;  %3259 = vmatprep.mubr.f32.mxu1 %v4701_v41  ;;  %v5398_v41 = vld [vmem:[#allocation14_spill] sm:$0xff] }
  0xf3   : > { %3483 = vmatprep.mubr.f32.mxu0 %v4814_v18  ;;  %3826 = vmatprep.subr.bf16.mxu0 %v3825_v61 }
  0xf4   : > { %3260 = vmatmul.mubr.f32.gmra.mrb[12].mxu1 %v4715_v51  ;;  %3839 = vmatprep.subr.bf16.mxu1 %v3825_v61 }
  0xf5   : > { %3484 = vmatmul.mubr.f32.gmra.mrb[12].mxu0 %v4839_v60  ;;  %3847 = vmatpush3.bf16.msra.mxu1 %v3825_v61 }
  0xf6   : > { %3828 = vmatpush3.bf16.msra.mxu0 %v3825_v61  ;;  %3262 = vmatprep.mubr.f32.mxu1 %v4755_v21 }
  0xf7   : > { %3486 = vmatprep.mubr.f32.mxu0 %v5397_v11  ;;  %3830 = vmatprep.subr.bf16.mxu0 %v3829_v10 }
  0xf8   : > { %3263 = vmatmul.mubr.f32.gmra.mrb[14].mxu1 %v4758_v22  ;;  %3840 = vmatprep.subr.bf16.mxu1 %v3829_v10 }
  0xf9   : > { %3487 = vmatmul.mubr.f32.gmra.mrb[14].mxu0 %v4844_v30  ;;  %3848 = vmatpush3.bf16.msra.mxu1 %v3829_v10 }
  0xfa   : > { %3832 = vmatpush3.bf16.msra.mxu0 %v3829_v10  ;;  %3521 = vmatprep.mubr.f32.mxu0 %v4876_v24 }
  0xfb   : > { %3533 = vmatprep.mubr.f32.mxu1 %v4976_v52 }
  0xfc   : > { %3534 = vmatmul.mubr.f32.vlgmr.msra.gmra.mrb[16].mxu1 %v4995_v54 }
  0xfd   : > { %3522 = vmatmul.mubr.f32.vlgmr.msra.gmra.mrb[0].mxu0 %v4895_v45  ;;  %3536 = vmatprep.mubr.f32.mxu1 %v5001_v20 }
  0xfe   : > { %3524 = vmatprep.mubr.f32.mxu0 %v4901_v38 }
 0x100   : > { %3537 = vmatmul.mubr.f32.gmra.mrb[18].mxu1 %v5020_v13 }
 0x101   : > { %3525 = vmatmul.mubr.f32.gmra.mrb[2].mxu0 %v4920_v3  ;;  %3539 = vmatprep.mubr.f32.mxu1 %v5026_v55 }
 0x102   : > { %3527 = vmatprep.mubr.f32.mxu0 %v4926_v19 }
 0x104   : > { %3540 = vmatmul.mubr.f32.gmra.mrb[20].mxu1 %v5043_v34 }
 0x105   : > { %3528 = vmatmul.mubr.f32.gmra.mrb[4].mxu0 %v4945_v59  ;;  %3542 = vmatprep.mubr.f32.mxu1 %v4835_v56 }
 0x106   : > { %3530 = vmatprep.mubr.f32.mxu0 %v4951_v0 }
 0x108   : > { %3543 = vmatmul.mubr.f32.gmra.mrb[22].mxu1 %v5398_v41 }
 0x109   : > { %3531 = vmatmul.mubr.f32.gmra.mrb[6].mxu0 %v4970_v44 }
 0x1af   : > { %v3243_v51 = vpop.f32.mrb[0].mxu1 }
 0x1b0   : > { %v1303_v58 = vpop.f32.mrb[1].mxu1 }
 0x1b3   : > { %v3246_v21 = vpop.f32.mrb[2].mxu1 }
 0x1b4   : > { %v1313_v22 = vpop.f32.mrb[3].mxu1 }
 0x1b7   : > { %v5260_v30 = vpop.f32.mrb[4].mxu1 }
 0x1b8   : > { %v5262_v48 = vpop.f32.mrb[5].mxu1 }
 0x1bb   : > { %v5264_v57 = vpop.f32.mrb[6].mxu1 }
 0x1bc   : > { %v5266_v1 = vpop.f32.mrb[7].mxu1 }
 0x1bf   : > { %v3255_v18 = vpop.f32.mrb[8].mxu1 }
 0x1c0   : > { %v3479_v56 = vpop.f32.mrb[8].mxu0  ;;  %v1343_v60 = vpop.f32.mrb[9].mxu1 }
 0x1c1   : > { %v3857_v24 = vadd.f32 %v3479_v56, %v3255_v18  ;;  %v2082_v45 = vpop.f32.mrb[9].mxu0 }
 0x1c2   : > { %v3859_v38 = vadd.f32 %v2082_v45, %v1343_v60 }
 0x1c3   : > { %v3258_v3 = vpop.f32.mrb[10].mxu1 }
 0x1c4   : > { %v3482_v19 = vpop.f32.mrb[10].mxu0  ;;  %v1353_v59 = vpop.f32.mrb[11].mxu1 }
 0x1c5   : > { %v3861_v0 = vadd.f32 %v3482_v19, %v3258_v3  ;;  %v2092_v44 = vpop.f32.mrb[11].mxu0 }
 0x1c6   : > { %v3863_v52 = vadd.f32 %v2092_v44, %v1353_v59 }
 0x1c7   : > { %v3261_v54 = vpop.f32.mrb[12].mxu1 }
 0x1c8   : > { %v3485_v20 = vpop.f32.mrb[12].mxu0  ;;  %v1363_v13 = vpop.f32.mrb[13].mxu1 }
 0x1c9   : > { %v3865_v55 = vadd.f32 %v3485_v20, %v3261_v54  ;;  %v2102_v34 = vpop.f32.mrb[13].mxu0 }
 0x1ca   : > { %v3867_v8 = vadd.f32 %v2102_v34, %v1363_v13 }
 0x1cb   : > { %v3264_v42 = vpop.f32.mrb[14].mxu1 }
 0x1cc   : > { %v3488_v25 = vpop.f32.mrb[14].mxu0  ;;  %v1373_v12 = vpop.f32.mrb[15].mxu1 }
 0x1cd   : > { %v3869_v37 = vadd.f32 %v3488_v25, %v3264_v42  ;;  %v2112_v63 = vpop.f32.mrb[15].mxu0 }
 0x1ce   : > { %v3871_v32 = vadd.f32 %v2112_v63, %v1373_v12 }
 0x1cf   : > { %v3535_v28 = vpop.f32.mrb[16].mxu1 }
 0x1d0   : > { %v3523_v26 = vpop.f32.mrb[0].mxu0  ;;  %v3858_v36 = vadd.f32 %v3857_v24, %v3535_v28  ;;  %v2267_v5 = vpop.f32.mrb[17].mxu1 }
 0x1d1   : > { %v3849_v29 = vadd.f32 %v3523_v26, %v3243_v51  ;;  %v2227_v17 = vpop.f32.mrb[1].mxu0  ;;  %v3860_v23 = vadd.f32 %v3859_v38, %v2267_v5 }
 0x1d2   : > { %v2338_v9 = vmul.f32 %v3858_v36, %v5273_v2  ;;  %v3850_v39 = vadd.f32 %v2227_v17, %v1303_v58 }
 0x1d3   : > { %v2330_v49 = vmul.f32 %v3849_v29, %v5273_v2  ;;  %v2337_v35 = vmul.f32 %v3860_v23, %v5273_v2  ;;  %v3538_v31 = vpop.f32.mrb[18].mxu1 }
 0x1d4   : > { %2354 = vst [vmem:[%s4265_s30 + $0x48] sm:$0xff] %v2338_v9  ;;  %v2329_v33 = vmul.f32 %v3850_v39, %v5273_v2  ;;  %v3526_v40 = vpop.f32.mrb[2].mxu0  ;;  %v3862_v6 = vadd.f32 %v3861_v0, %v3538_v31  ;;  %v2277_v7 = vpop.f32.mrb[19].mxu1 }
 0x1d5   : > { %2346 = vst [vmem:[%s4265_s30 + $0x8] sm:$0xff] %v2330_v49  ;;  %2353 = vst [vmem:[%s4265_s30 + $0x40] sm:$0xff] %v2337_v35  ;;  %v3851_v50 = vadd.f32 %v3526_v40, %v3246_v21  ;;  %v2237_v15 = vpop.f32.mrb[3].mxu0  ;;  %v3864_v16 = vadd.f32 %v3863_v52, %v2277_v7 }
 0x1d6   : > { %2345 = vst [vmem:[%s4265_s30] sm:$0xff] %v2329_v33  ;;  %v2340_v53 = vmul.f32 %v3862_v6, %v5273_v2  ;;  %v3852_v46 = vadd.f32 %v2237_v15, %v1313_v22 }
 0x1d7   : > { %v2332_v4 = vmul.f32 %v3851_v50, %v5273_v2  ;;  %v2339_v47 = vmul.f32 %v3864_v16, %v5273_v2  ;;  %v3541_v14 = vpop.f32.mrb[20].mxu1 }
 0x1d8   : > { %2356 = vst [vmem:[%s4265_s30 + $0x58] sm:$0xff] %v2340_v53  ;;  %v2331_v27 = vmul.f32 %v3852_v46, %v5273_v2  ;;  %v3529_v61 = vpop.f32.mrb[4].mxu0  ;;  %v3866_v62 = vadd.f32 %v3865_v55, %v3541_v14  ;;  %v2287_v43 = vpop.f32.mrb[21].mxu1 }
 0x1d9   : > { %2348 = vst [vmem:[%s4265_s30 + $0x18] sm:$0xff] %v2332_v4  ;;  %2355 = vst [vmem:[%s4265_s30 + $0x50] sm:$0xff] %v2339_v47  ;;  %v3853_v10 = vadd.f32 %v3529_v61, %v5260_v30  ;;  %v2247_v11 = vpop.f32.mrb[5].mxu0  ;;  %v3868_v41 = vadd.f32 %v3867_v8, %v2287_v43 }
 0x1da   : > { %2347 = vst [vmem:[%s4265_s30 + $0x10] sm:$0xff] %v2331_v27  ;;  %v2342_v51 = vmul.f32 %v3866_v62, %v5273_v2  ;;  %v3854_v58 = vadd.f32 %v2247_v11, %v5262_v48 }
 0x1db   : > { %v2334_v21 = vmul.f32 %v3853_v10, %v5273_v2  ;;  %v2341_v22 = vmul.f32 %v3868_v41, %v5273_v2  ;;  %v3544_v18 = vpop.f32.mrb[22].mxu1 }
 0x1dc   : > { %2358 = vst [vmem:[%s4265_s30 + $0x68] sm:$0xff] %v2342_v51  ;;  %v2333_v30 = vmul.f32 %v3854_v58, %v5273_v2  ;;  %v3532_v56 = vpop.f32.mrb[6].mxu0  ;;  %v3870_v60 = vadd.f32 %v3869_v37, %v3544_v18  ;;  %v2297_v24 = vpop.f32.mrb[23].mxu1 }
 0x1dd   : > { %2350 = vst [vmem:[%s4265_s30 + $0x28] sm:$0xff] %v2334_v21  ;;  %2357 = vst [vmem:[%s4265_s30 + $0x60] sm:$0xff] %v2341_v22  ;;  %v3855_v48 = vadd.f32 %v3532_v56, %v5264_v57  ;;  %v2257_v45 = vpop.f32.mrb[7].mxu0  ;;  %v3872_v38 = vadd.f32 %v3871_v32, %v2297_v24 }
 0x1de   : > { %2349 = vst [vmem:[%s4265_s30 + $0x20] sm:$0xff] %v2333_v30  ;;  %v2344_v3 = vmul.f32 %v3870_v60, %v5273_v2  ;;  %v3856_v19 = vadd.f32 %v2257_v45, %v5266_v1 }
 0x1df   : > { %v2336_v59 = vmul.f32 %v3855_v48, %v5273_v2  ;;  %v2343_v0 = vmul.f32 %v3872_v38, %v5273_v2 }
 0x1e0   : > { %2360 = vst [vmem:[%s4265_s30 + $0x78] sm:$0xff] %v2344_v3  ;;  %v2335_v57 = vmul.f32 %v3856_v19, %v5273_v2 }
 0x1e1   : > { %2352 = vst [vmem:[%s4265_s30 + $0x38] sm:$0xff] %v2336_v59  ;;  %2359 = vst [vmem:[%s4265_s30 + $0x70] sm:$0xff] %v2343_v0 }
 0x1e2   : > { %2351 = vst [vmem:[%s4265_s30 + $0x30] sm:$0xff] %v2335_v57 }
 0x1e3   : > { %4063 = shalt.err (!%p4060_p9)
}
 0x1e4   : > { %s4064_s30 = scalar_lea.hbm %s5312_s26, 2048  ;;  %s4068_s11 = scalar_lea.hbm %s5379_s4, 8192 }
 0x1e5   : > { %p4065_p10 = scmp.ne.s32.totalorder %s5312_s26, %s4064_s30  ;;  %p4069_p13 = scmp.lt.u32.totalorder %s5312_s26, %s5379_s4 }
 0x1e6   : > { %p4070_p0 = scmp.lt.u32.totalorder %s4068_s11, %s4064_s30  ;;  %p4072_p2 = scmp.lt.u32.totalorder %s4064_s30, %s5312_s26 }
 0x1e7   : > { %p4066_p11 = pnand %p4065_p10, %p4227_p3 }
 0x1e8   : > { %p4071_p1 = por %p4070_p0, %p4069_p13 }
 0x1e9   : > { %p4067_p12 = pneg %p4066_p11 }
 0x1ea   : > { %p4073_p4 = por %p4072_p2, %p4071_p1 }
 0x1ec   : > { %p4074_p5 = pnand %p4073_p4, %p4067_p12 }
 0x1ee   : > { %4077 = shalt.err (!%p4074_p5)
}
 0x1ef   : > { %s4149_s19 = smov 128   ;;  %s4150_s14 = smov 8  }
 0x1f0   : > { %3977 = dma.vmem_to_hbm [thread:$0]  (%p4227_p3), %s5314_s8, 2048, %s5312_s26, %s5323_s9, %s4149_s19, %s4149_s19, %s4150_s14  }
 0x1f1 PF: > { %p3983_p6 = scmp.ge.s32.totalorder %s4146_s22, 2  ;;  %s2394_s10 = sand.u32 1, %s4118_s15  }
 0x1f2   : > { %s2395_s12 = scalar_lea.sflag [#allocation5], %s2394_s10 }
 0x1f3   : > { %p3980_p7 = pnand %p3983_p6, %p4236_p8 }
 0x1f5   : > { %4113 = dma.done.wait (!%p3980_p7), %s2395_s12, 2048  }
 0x1f6   : > { %4115 = vsyncadd (!%p3980_p7), %s2395_s12, 4294965248  ;;  %s17_s22 = sadd.s32 1, %s4146_s22   ;;  %s5401_s28 = sld [smem:[#allocation10_spill]] }
 0x1f7   : > { %p14_p9 = scmp.ge.s32.totalorder %s17_s22, 6   ;;  %s5402_s15 = smov %s4122_s16 }
 0x1f8   : > { %s5403_s16 = smov %s4126_s17  ;;  %s5404_s17 = smov %s4245_s7 }
 0x1f9   : > { %s5405_s18 = smov %s4138_s20  ;;  %s5406_s19 = smov %s4142_s21 }
 0x1fa   : > { %s5407_s20 = smov %s5410_s25  ;;  %16 = sbr.rel (!%p14_p9) target bundleno = 7 (0x7), region = 198 }
 0x1fc   : > { %s5408_s21 = smov %s5401_s28 }
 0x201   :  { %2400 = vsyncpa [#allocation5], 1 }
 0x202   :  { %2402 = vsyncpa [#allocation5 + $0x1], 1 }
 0x203   :  { %2403 = vsyncmov [#allocation3] }
 0x206   :  { %s2404_s29 = vpop.sfrf %2403 }
 0x207   :  { %p2750_p3 = scmp.ne.s32.totalorder %s2404_s29, 0 }
 0x209   :  { %2408 = shalt.err (%p2750_p3)  }
 0x20a   :  { %2410 = vsyncmov [#allocation3 + $0x1] }
 0x20d   :  { %s2411_s8 = vpop.sfrf %2410 }
 0x20e   :  { %p2751_p8 = scmp.ne.s32.totalorder %s2411_s8, 0 }
 0x210   :  { %2415 = shalt.err (%p2751_p8)  }

</bundles_post_ra>
